<compile_context>
chip_gen: v7x
topology: tpu7x:2x2x1
jax: 0.10.0
libtpu: 0.0.40
codegen_flags: <defaults>
</compile_context>

<pallas_src>
import jax
import jax.numpy as jnp
from jax.experimental import pallas as pl
from jax.experimental.pallas import tpu as pltpu

HIDDEN = 500
HIDDEN_PAD = 512      # next multiple of 128
DEFAULT_TILE = 1024   # max rows per grid step (large-N amortization)

# Rows of the packed (8, HIDDEN_PAD) vector operand.
ROW_W1T = 0   # first-layer weights for the (constant) t column
ROW_W1Y = 1   # first-layer weights for the y column
ROW_B1 = 2    # bias 1 (zeros at init)
ROW_B2 = 3    # bias 2 (zeros at init)
ROW_W3 = 4    # last-layer weights (transposed row)


def _round_up(x, m):
    return (x + m - 1) // m * m


def _cdiv(a, b):
    return -(-a // b)


def _choose_tile(n, num_evals):
    """Row-tile size: multiple of 16 (so the kernel can 2-way sub-block) and
    guaranteeing >= 2 total grid steps when there is enough work, so both
    v7x TensorCores are used."""
    tile = min(DEFAULT_TILE, _round_up(n, 16))
    if num_evals * _cdiv(n, tile) < 2 and n > 16:
        tile = _round_up(_cdiv(n, 2), 16)
    return tile


def _mlp_kernel(ts_ref, b3_ref, y_ref, vecs_ref, w2_ref, o_ref):
    # ts_ref: (E,) SMEM, b3_ref: (1,) SMEM
    # y_ref / o_ref: (tile, 1) VMEM row-tile of the current evaluation
    # vecs_ref: (8, 512) packed row vectors, w2_ref: (512, 512)
    t = ts_ref[pl.program_id(0)]
    b3 = b3_ref[0]

    w1y = vecs_ref[ROW_W1Y:ROW_W1Y + 1, :]                      # (1, 512)
    b2 = vecs_ref[ROW_B2:ROW_B2 + 1, :]
    w3 = vecs_ref[ROW_W3:ROW_W3 + 1, :]
    # Layer 1: fold the constant-t column into an effective bias (VPU only).
    bias1 = t * vecs_ref[ROW_W1T:ROW_W1T + 1, :] + vecs_ref[ROW_B1:ROW_B1 + 1, :]
    w2 = w2_ref[...]

    tile = y_ref.shape[0]
    n_sub = 2 if (tile >= 16 and tile % 16 == 0) else 1
    sub = tile // n_sub
    # Two independent sub-blocks: the EUP tanh of one overlaps the MXU dot of
    # the other (straight-line after trace; the LLO scheduler interleaves).
    for s in range(n_sub):
        rows = slice(s * sub, (s + 1) * sub)
        h1 = jnp.tanh(y_ref[rows, :] * w1y + bias1)              # (sub, 512)
        h2 = jnp.tanh(                                            # MXU matmul
            jnp.dot(h1.astype(w2.dtype), w2,
                    preferred_element_type=jnp.float32) + b2)
        # Layer 3 on VPU + XLU: multiply by the w3 row, reduce over lanes.
        o_ref[rows, :] = jnp.sum(h2 * w3, axis=-1, keepdims=True) + b3


def init_params(key, w2_dtype=jnp.float32):
    """Deterministic init matching nn.init.normal_(std=0.1), bias=0.

    Returns (vecs, w2, b3):
      vecs : (8, 512) packed rows [w1_t, w1_y, b1, b2, w3, 0, 0, 0], f32
      w2   : (512, 512) in `w2_dtype` (f32 default; bf16 halves the weight DMA
             and uses the native bf16 MXU, ~1e-3 drift)
      b3   : (1,) f32 scalar
    """
    k1, k2, k3 = jax.random.split(key, 3)
    w1 = 0.1 * jax.random.normal(k1, (2, HIDDEN), dtype=jnp.float32)
    w2 = 0.1 * jax.random.normal(k2, (HIDDEN, HIDDEN), dtype=jnp.float32)
    w3 = 0.1 * jax.random.normal(k3, (HIDDEN,), dtype=jnp.float32)

    vecs = jnp.zeros((8, HIDDEN_PAD), jnp.float32)
    vecs = vecs.at[ROW_W1T, :HIDDEN].set(w1[0])
    vecs = vecs.at[ROW_W1Y, :HIDDEN].set(w1[1])
    # ROW_B1 / ROW_B2 stay zero (constant_(bias, 0)).
    vecs = vecs.at[ROW_W3, :HIDDEN].set(w3)

    w2p = (jnp.zeros((HIDDEN_PAD, HIDDEN_PAD), jnp.float32)
           .at[:HIDDEN, :HIDDEN].set(w2).astype(w2_dtype))
    b3 = jnp.zeros((1,), jnp.float32)
    return vecs, w2p, b3


def _mlp_pallas(ts, y3, params):
    """ts: (E,) times, y3: (E, N, 1) states -> (E, N, 1) outputs."""
    vecs, w2, b3 = params
    e, n = y3.shape[0], y3.shape[1]
    tile = _choose_tile(n, e)
    n_pad = _round_up(n, tile)
    if n_pad != n:
        y3 = jnp.pad(y3, ((0, 0), (0, n_pad - n), (0, 0)))
    grid = (e, n_pad // tile)

    const_spec = lambda shape: pl.BlockSpec(shape, lambda ei, ri: (0, 0))
    smem = pl.BlockSpec(memory_space=pltpu.MemorySpace.SMEM)

    w2_bytes = HIDDEN_PAD * HIDDEN_PAD * jnp.dtype(w2.dtype).itemsize
    cost = pl.CostEstimate(
        flops=e * n_pad * (2 * HIDDEN_PAD * HIDDEN_PAD + 8 * HIDDEN_PAD),
        transcendentals=e * n_pad * 2 * HIDDEN_PAD,
        bytes_accessed=w2_bytes + 4 * (8 * HIDDEN_PAD + e * (2 * n_pad + 1) + 1),
    )

    out = pl.pallas_call(
        _mlp_kernel,
        out_shape=jax.ShapeDtypeStruct((e, n_pad, 1), jnp.float32),
        grid=grid,
        in_specs=[
            smem,                                                     # ts (E,)
            smem,                                                     # b3 (1,)
            pl.BlockSpec((None, tile, 1), lambda ei, ri: (ei, ri, 0)),  # y tile
            const_spec((8, HIDDEN_PAD)),                              # packed vecs
            const_spec((HIDDEN_PAD, HIDDEN_PAD)),                     # w2
        ],
        out_specs=pl.BlockSpec((None, tile, 1), lambda ei, ri: (ei, ri, 0)),
        compiler_params=pltpu.CompilerParams(
            dimension_semantics=("parallel", "parallel")),
        cost_estimate=cost,
    )(ts, b3, y3, vecs, w2)
    return out[:, :n, :]


def ode_func(t_scalar, y, params):
    """Equivalent of ODEFunc.forward(t, y).

    t_scalar: scalar time; y: (N,) or (N, 1) state.
    Returns (N, 1), or a squeezed scalar if N == 1 (matching the PyTorch code).
    """
    n = y.shape[0]
    y3 = jnp.reshape(y, (1, n, 1)).astype(jnp.float32)
    ts = jnp.asarray(t_scalar, jnp.float32).reshape(1)
    result = _mlp_pallas(ts, y3, params)[0]           # (n, 1)
    if n == 1:
        result = jnp.squeeze(result)
    return result


def ode_func_fused(ts, ys, params):
    """Fused evaluation of E (t, y) pairs sharing one weight DMA.

    ts: (E,) times, ys: (E, N) states -> (E, N, 1).
    Use this for all RK stages of a solver step / batched vector fields.
    """
    e, n = ys.shape
    y3 = jnp.reshape(ys, (e, n, 1)).astype(jnp.float32)
    ts = jnp.asarray(ts, jnp.float32).reshape(e)
    return _mlp_pallas(ts, y3, params)


if __name__ == "__main__":
    key = jax.random.PRNGKey(0)
    pkey, ykey = jax.random.split(key)
    params = init_params(pkey)
    vecs, w2, b3 = params

    def reference(t, y):
        # Plain-JAX reference of the same math, structured like the original
        # module (concat [t, y], then three dense layers).
        n = y.shape[0]
        y2 = y.reshape(n, 1).astype(jnp.float32)
        eq = jnp.concatenate([jnp.full((n, 1), t, jnp.float32), y2], axis=1)
        w1_full = vecs[ROW_W1T:ROW_W1Y + 1]                       # (2, 512)
        h = jnp.tanh(eq @ w1_full + vecs[ROW_B1:ROW_B1 + 1])
        h = jnp.tanh(h @ w2.astype(jnp.float32) + vecs[ROW_B2:ROW_B2 + 1])
        return h @ vecs[ROW_W3:ROW_W3 + 1].T + b3                 # (n, 1)

    t = jnp.float32(0.5)

    # Small batch: single grid step (tile padded to 16 rows).
    y_small = jax.random.normal(ykey, (8,), dtype=jnp.float32)
    out_small = ode_func(t, y_small, params)
    jax.block_until_ready(out_small)
    assert out_small.shape == (8, 1)
    assert jnp.allclose(out_small, reference(t, y_small), atol=1e-4, rtol=1e-4)

    # Larger batch: exercises row tiling (2 tiles of 512) and padding 1000->1024.
    y_big = jax.random.normal(jax.random.PRNGKey(1), (1000,), dtype=jnp.float32)
    out_big = ode_func(t, y_big, params)
    jax.block_until_ready(out_big)
    assert out_big.shape == (1000, 1)
    assert jnp.allclose(out_big, reference(t, y_big), atol=1e-4, rtol=1e-4)

    # Fused multi-evaluation: 4 "RK stages" share a single weight DMA.
    ts_fused = jnp.array([0.0, 0.125, 0.125, 0.25], jnp.float32)
    ys_fused = jax.random.normal(jax.random.PRNGKey(2), (4, 64), jnp.float32)
    out_fused = ode_func_fused(ts_fused, ys_fused, params)
    jax.block_until_ready(out_fused)
    assert out_fused.shape == (4, 64, 1)
    for s in range(4):
        assert jnp.allclose(out_fused[s], reference(ts_fused[s], ys_fused[s]),
                            atol=1e-4, rtol=1e-4)

    # N == 1 path (PyTorch squeezes the result).
    out_one = ode_func(t, jnp.ones((1,), jnp.float32), params)
    jax.block_until_ready(out_one)
    assert out_one.shape == ()

    # Optional bf16-w2 path: half the weight DMA, native bf16 MXU, small drift.
    params_bf16 = init_params(pkey, w2_dtype=jnp.bfloat16)
    out_bf16 = ode_func(t, y_small, params_bf16)
    jax.block_until_ready(out_bf16)
    assert jnp.allclose(out_bf16, reference(t, y_small), atol=5e-2, rtol=5e-2)

    print("KERNEL_OK")
</pallas_src>

<mosaic_0001>
module attributes {stable_mosaic.version = 11 : i64} {
  func.func @_mlp_kernel(%arg0: i32, %arg1: i32, %arg2: memref<1xf32, #tpu.memory_space<smem>>, %arg3: memref<1xf32, #tpu.memory_space<smem>>, %arg4: memref<1x16x1xf32, #tpu.memory_space<vmem>>, %arg5: memref<8x512xf32, #tpu.memory_space<vmem>>, %arg6: memref<512x512xf32, #tpu.memory_space<vmem>>, %arg7: memref<1x16x1xf32, #tpu.memory_space<vmem>>) attributes {dimension_semantics = [#tpu.dimension_semantics<parallel>, #tpu.dimension_semantics<parallel>], iteration_bounds = array<i64: 1, 1>, scalar_prefetch = 0 : i64, scratch_operands = 0 : i64, tpu.core_type = #tpu.core_type<tc>, window_params = [{transform_indices = @transform_0, window_bounds = array<i64: 1>}, {transform_indices = @transform_1, window_bounds = array<i64: 1>}, {transform_indices = @transform_2, window_bounds = array<i64: 1, 16, 1>}, {pipeline_mode = #tpu.pipeline_mode<synchronous>, transform_indices = @transform_3, window_bounds = array<i64: 8, 512>}, {pipeline_mode = #tpu.pipeline_mode<synchronous>, transform_indices = @transform_4, window_bounds = array<i64: 512, 512>}, {transform_indices = @transform_5, window_bounds = array<i64: 1, 16, 1>}]} {
    %0 = arith.index_cast %arg0 : i32 to index
    %1 = memref.load %arg2[%0] : memref<1xf32, #tpu.memory_space<smem>>
    %c0 = arith.constant 0 : index
    %2 = memref.load %arg3[%c0] : memref<1xf32, #tpu.memory_space<smem>>
    %c1 = arith.constant 1 : index
    %c0_0 = arith.constant 0 : index
    %3 = vector.load %arg5[%c1, %c0_0] : memref<8x512xf32, #tpu.memory_space<vmem>>, vector<1x512xf32>
    %c3 = arith.constant 3 : index
    %c0_1 = arith.constant 0 : index
    %4 = vector.load %arg5[%c3, %c0_1] : memref<8x512xf32, #tpu.memory_space<vmem>>, vector<1x512xf32>
    %c4 = arith.constant 4 : index
    %c0_2 = arith.constant 0 : index
    %5 = vector.load %arg5[%c4, %c0_2] : memref<8x512xf32, #tpu.memory_space<vmem>>, vector<1x512xf32>
    %c0_3 = arith.constant 0 : index
    %c0_4 = arith.constant 0 : index
    %6 = vector.load %arg5[%c0_3, %c0_4] : memref<8x512xf32, #tpu.memory_space<vmem>>, vector<1x512xf32>
    %7 = vector.broadcast %1 : f32 to vector<1x512xf32>
    %8 = arith.mulf %7, %6 : vector<1x512xf32>
    %c2 = arith.constant 2 : index
    %c0_5 = arith.constant 0 : index
    %9 = vector.load %arg5[%c2, %c0_5] : memref<8x512xf32, #tpu.memory_space<vmem>>, vector<1x512xf32>
    %10 = arith.addf %8, %9 : vector<1x512xf32>
    %c0_6 = arith.constant 0 : index
    %c0_7 = arith.constant 0 : index
    %11 = vector.load %arg6[%c0_6, %c0_7] : memref<512x512xf32, #tpu.memory_space<vmem>>, vector<512x512xf32>
    %c0_8 = arith.constant 0 : index
    %c0_9 = arith.constant 0 : index
    %c0_10 = arith.constant 0 : index
    %12 = vector.load %arg4[%c0_8, %c0_9, %c0_10] : memref<1x16x1xf32, #tpu.memory_space<vmem>>, vector<1x8x1xf32>
    %13 = vector.shape_cast %12 : vector<1x8x1xf32> to vector<8x1xf32>
    %14 = vector.broadcast %13 : vector<8x1xf32> to vector<8x512xf32>
    %15 = vector.broadcast %3 : vector<1x512xf32> to vector<8x512xf32>
    %16 = arith.mulf %14, %15 : vector<8x512xf32>
    %17 = vector.broadcast %10 : vector<1x512xf32> to vector<8x512xf32>
    %18 = arith.addf %16, %17 : vector<8x512xf32>
    %19 = math.tanh %18 : vector<8x512xf32>
    %cst = arith.constant dense<0.000000e+00> : vector<8x512xf32>
    %20 = tpu.matmul %19, %11, %cst {dimension_numbers = #tpu.dot_dimension_numbers<[1], [0], [0], [1], [0, 0, 1, 1], [], []>} : vector<8x512xf32>, vector<512x512xf32>, vector<8x512xf32> -> vector<8x512xf32>
    %21 = vector.broadcast %4 : vector<1x512xf32> to vector<8x512xf32>
    %22 = arith.addf %20, %21 : vector<8x512xf32>
    %23 = math.tanh %22 : vector<8x512xf32>
    %24 = vector.broadcast %5 : vector<1x512xf32> to vector<8x512xf32>
    %25 = arith.mulf %23, %24 : vector<8x512xf32>
    %cst_11 = arith.constant dense<0.000000e+00> : vector<8xf32>
    %26 = vector.multi_reduction <add>, %25, %cst_11 [1] : vector<8x512xf32> to vector<8xf32>
    %27 = vector.shape_cast %26 : vector<8xf32> to vector<8x1xf32>
    %28 = vector.broadcast %2 : f32 to vector<8x1xf32>
    %29 = arith.addf %27, %28 : vector<8x1xf32>
    %c0_12 = arith.constant 0 : index
    %c0_13 = arith.constant 0 : index
    %c0_14 = arith.constant 0 : index
    %30 = vector.load %arg7[%c0_12, %c0_13, %c0_14] : memref<1x16x1xf32, #tpu.memory_space<vmem>>, vector<1x8x1xf32>
    %31 = vector.shape_cast %30 : vector<1x8x1xf32> to vector<8x1xf32>
    %32 = vector.shape_cast %29 : vector<8x1xf32> to vector<1x8x1xf32>
    tpu.vector_store %arg7[%c0_12, %c0_13, %c0_14], %32 {strides = array<i32>} : memref<1x16x1xf32, #tpu.memory_space<vmem>>, vector<1x8x1xf32>,
    %c0_15 = arith.constant 0 : index
    %c8 = arith.constant 8 : index
    %c0_16 = arith.constant 0 : index
    %33 = vector.load %arg4[%c0_15, %c8, %c0_16] : memref<1x16x1xf32, #tpu.memory_space<vmem>>, vector<1x8x1xf32>
    %34 = vector.shape_cast %33 : vector<1x8x1xf32> to vector<8x1xf32>
    %35 = vector.broadcast %34 : vector<8x1xf32> to vector<8x512xf32>
    %36 = vector.broadcast %3 : vector<1x512xf32> to vector<8x512xf32>
    %37 = arith.mulf %35, %36 : vector<8x512xf32>
    %38 = vector.broadcast %10 : vector<1x512xf32> to vector<8x512xf32>
    %39 = arith.addf %37, %38 : vector<8x512xf32>
    %40 = math.tanh %39 : vector<8x512xf32>
    %cst_17 = arith.constant dense<0.000000e+00> : vector<8x512xf32>
    %41 = tpu.matmul %40, %11, %cst_17 {dimension_numbers = #tpu.dot_dimension_numbers<[1], [0], [0], [1], [0, 0, 1, 1], [], []>} : vector<8x512xf32>, vector<512x512xf32>, vector<8x512xf32> -> vector<8x512xf32>
    %42 = vector.broadcast %4 : vector<1x512xf32> to vector<8x512xf32>
    %43 = arith.addf %41, %42 : vector<8x512xf32>
    %44 = math.tanh %43 : vector<8x512xf32>
    %45 = vector.broadcast %5 : vector<1x512xf32> to vector<8x512xf32>
    %46 = arith.mulf %44, %45 : vector<8x512xf32>
    %cst_18 = arith.constant dense<0.000000e+00> : vector<8xf32>
    %47 = vector.multi_reduction <add>, %46, %cst_18 [1] : vector<8x512xf32> to vector<8xf32>
    %48 = vector.shape_cast %47 : vector<8xf32> to vector<8x1xf32>
    %49 = vector.broadcast %2 : f32 to vector<8x1xf32>
    %50 = arith.addf %48, %49 : vector<8x1xf32>
    %c0_19 = arith.constant 0 : index
    %c8_20 = arith.constant 8 : index
    %c0_21 = arith.constant 0 : index
    %51 = vector.load %arg7[%c0_19, %c8_20, %c0_21] : memref<1x16x1xf32, #tpu.memory_space<vmem>>, vector<1x8x1xf32>
    %52 = vector.shape_cast %51 : vector<1x8x1xf32> to vector<8x1xf32>
    %53 = vector.shape_cast %50 : vector<8x1xf32> to vector<1x8x1xf32>
    tpu.vector_store %arg7[%c0_19, %c8_20, %c0_21], %53 {strides = array<i32>} : memref<1x16x1xf32, #tpu.memory_space<vmem>>, vector<1x8x1xf32>,
    return
  }
  func.func @transform_0(%arg0: i32, %arg1: i32) -> i32 {
    %c0_i32 = arith.constant 0 : i32
    %c0_i32_0 = arith.constant 0 : i32
    return %c0_i32 : i32
  }
  func.func @transform_1(%arg0: i32, %arg1: i32) -> i32 {
    %c0_i32 = arith.constant 0 : i32
    %c0_i32_0 = arith.constant 0 : i32
    return %c0_i32 : i32
  }
  func.func @transform_2(%arg0: i32, %arg1: i32) -> (i32, i32, i32) {
    %c0_i32 = arith.constant 0 : i32
    %c0_i32_0 = arith.constant 0 : i32
    return %arg0, %arg1, %c0_i32 : i32, i32, i32
  }
  func.func @transform_3(%arg0: i32, %arg1: i32) -> (i32, i32) {
    %c0_i32 = arith.constant 0 : i32
    %c0_i32_0 = arith.constant 0 : i32
    %c0_i32_1 = arith.constant 0 : i32
    return %c0_i32, %c0_i32_0 : i32, i32
  }
  func.func @transform_4(%arg0: i32, %arg1: i32) -> (i32, i32) {
    %c0_i32 = arith.constant 0 : i32
    %c0_i32_0 = arith.constant 0 : i32
    %c0_i32_1 = arith.constant 0 : i32
    return %c0_i32, %c0_i32_0 : i32, i32
  }
  func.func @transform_5(%arg0: i32, %arg1: i32) -> (i32, i32, i32) {
    %c0_i32 = arith.constant 0 : i32
    %c0_i32_0 = arith.constant 0 : i32
    return %arg0, %arg1, %c0_i32 : i32, i32, i32
  }
}

</mosaic_0001>

<bundles_post_ra>
// kernel: tpu_custom_call.1
= control target key start
LH: loop header
LB: loop body
LE: loop exit
PB: predicated region body
PF: predicated region fallthrough
CT: control target
= control target key end

     0   :  { %12 = vsyncpa [#allocation5], 0  ;;  %s2293_s0 = inlined_call_operand.<no memory space> [shape: f32[1], index: 0, kind: input, shape index: {}]   ;;  %s2294_s1 = inlined_call_operand.<no memory space> [shape: f32[1], index: 1, kind: input, shape index: {}]   ;;  %s2295_s2 = inlined_call_operand.vmem [shape: f32[1,16,1], index: 2, kind: input, shape index: {}]   ;;  %s2296_s3 = inlined_call_operand.hbm [shape: f32[8,512], index: 3, kind: input, shape index: {}]   ;;  %s2297_s4 = inlined_call_operand.hbm [shape: f32[512,512], index: 4, kind: input, shape index: {}]   ;;  %s2298_s5 = inlined_call_operand.vmem [shape: f32[1,16,1], index: 5, kind: output, shape index: {}]  }
   0x1   :  { %13 = vsyncpa [#allocation7], 0  ;;  %s1658_s18 = smov [#allocation4]   ;;  %s1659_s20 = smov [#allocation6]  }
   0x2   :  { %s26_s19 = sshll.u32 %s1658_s18, 4  ;;  %s35_s21 = sshll.u32 %s1659_s20, 4  ;;  %s27_s19 = int_to_ptr.vmem [resolvable:$true] %s26_s19  ;;  %s1693_s21 = int_to_ptr.vmem [resolvable:$true] %s35_s21 }
   0x3   :  { %s1610_s24 = scalar_lea.hbm %s2296_s3, 512 }
   0x4   :  { %p1611_p0 = scmp.ne.s32.totalorder %s2296_s3, %s1610_s24  ;;  %p1614_p1 = scmp.lt.u32.totalorder %s1610_s24, %s2296_s3 }
   0x6   :  { %p1616_p2 = pnand %p1614_p1, %p1611_p0 }
   0x8   :  { %1619 = shalt.err (!%p1616_p2)
}
   0x9   :  { %s1620_s29 = scalar_lea.vmem %s27_s19, 512  ;;  %p1625_p4 = scmp.lt.s32.totalorder %s27_s19, %s27_s19 }
   0xa   :  { %p1621_p3 = scmp.ne.s32.totalorder %s27_s19, %s1620_s29  ;;  %p1626_p5 = scmp.lt.s32.totalorder %s1620_s29, %s1620_s29 }
   0xc   :  { %p1627_p6 = por %p1626_p5, %p1625_p4 }
   0xe   :  { %p1628_p7 = pnand %p1627_p6, %p1621_p3 }
  0x10   :  { %1631 = shalt.err (!%p1628_p7)
}
  0x11   :  { %29 = dma.hbm_to_vmem [thread:$0]  %s2296_s3, 512, %s27_s19, [#allocation5]  }
  0x12   :  { %s1632_s9 = scalar_lea.hbm %s2297_s4, 32768 }
  0x13   :  { %p1633_p8 = scmp.ne.s32.totalorder %s2297_s4, %s1632_s9  ;;  %p1636_p9 = scmp.lt.u32.totalorder %s1632_s9, %s2297_s4 }
  0x15   :  { %p1638_p10 = pnand %p1636_p9, %p1633_p8 }
  0x17   :  { %1641 = shalt.err (!%p1638_p10)
}
  0x18   :  { %s1642_s14 = scalar_lea.vmem %s1693_s21, 32768  ;;  %p1647_p12 = scmp.lt.s32.totalorder %s1693_s21, %s1693_s21 }
  0x19   :  { %p1643_p11 = scmp.ne.s32.totalorder %s1693_s21, %s1642_s14  ;;  %p1648_p13 = scmp.lt.s32.totalorder %s1642_s14, %s1642_s14 }
  0x1b   :  { %p1649_p0 = por %p1648_p13, %p1647_p12 }
  0x1d   :  { %p1650_p1 = pnand %p1649_p0, %p1643_p11 }
  0x1f   :  { %1653 = shalt.err (!%p1650_p1)
}
  0x20   :  { %s1660_s3 = smov 512   ;;  %s1661_s15 = smov 32  }
  0x21   :  { %41 = dma.hbm_to_vmem [thread:$0]  %s2297_s4, 32768, %s1693_s21, [#allocation7], %s1660_s3, %s1660_s3, %s1661_s15  }
  0x22   :  { %1654 = dma.done.wait [#allocation5], 512  }
  0x23   :  { %1655 = vsyncadd [#allocation5], 4294966784 }
  0x24   :  { %1656 = dma.done.wait [#allocation7], 32768  }
  0x25   :  { %1657 = vsyncadd [#allocation7], 4294934528  ;;  %v1662_v0 = vmov 0   ;;  %v318_v1 = vld [vmem:[%s2295_s2] sm:$0xff]  ;;  %v721_v2 = vld [vmem:[%s2295_s2 + $0x8] sm:$0xff]  ;;  %vm719_vm0 = vcmask 7168  }
  0x26   :  { %1577 = vset.pattern.permute.xlu0 %v1662_v0  ;;  %v63_v3 = vld [vmem:[#allocation6 + $0x8] sm:$0xff]  ;;  %v65_v5 = vld [vmem:[#allocation6 + $0x18] sm:$0xff]  ;;  %v62_v9 = vld [vmem:[#allocation6] sm:$0xff] }
  0x27   :  { %321 = vperm.xlu0 %1577, %v318_v1   ;;  %v67_v4 = vld [vmem:[#allocation6 + $0x28] sm:$0xff]  ;;  %v69_v6 = vld [vmem:[#allocation6 + $0x38] sm:$0xff]  ;;  %v66_v10 = vld [vmem:[#allocation6 + $0x20] sm:$0xff] }
  0x28   :  { %v1730_v7 = vpack.c.bf16 %v67_v4, %v63_v3  ;;  %v1732_v8 = vpack.c.bf16 %v69_v6, %v65_v5  ;;  %v64_v11 = vld [vmem:[#allocation6 + $0x10] sm:$0xff]  ;;  %v1734_v12 = vpack.c.bf16 %v66_v10, %v62_v9  ;;  %v71_v14 = vld [vmem:[#allocation6 + $0x48] sm:$0xff]  ;;  %v73_v18 = vld [vmem:[#allocation6 + $0x58] sm:$0xff] }
  0x29   :  { %v68_v13 = vld [vmem:[#allocation6 + $0x30] sm:$0xff]  ;;  %v75_v15 = vld [vmem:[#allocation6 + $0x68] sm:$0xff]  ;;  %v77_v19 = vld [vmem:[#allocation6 + $0x78] sm:$0xff] }
  0x2a   :  { %1045 = vmatprep.subr.bf16.mxu0 %v1730_v7  ;;  %1173 = vmatprep.subr.bf16.mxu1 %v1732_v8  ;;  %v1738_v16 = vpack.c.bf16 %v68_v13, %v64_v11  ;;  %v1740_v17 = vpack.c.bf16 %v75_v15, %v71_v14  ;;  %v70_v20 = vld [vmem:[#allocation6 + $0x40] sm:$0xff]  ;;  %v1743_v21 = vpack.c.bf16 %v77_v19, %v73_v18  ;;  %v72_v23 = vld [vmem:[#allocation6 + $0x50] sm:$0xff]  ;;  %v79_v27 = vld [vmem:[#allocation6 + $0x88] sm:$0xff] }
  0x2b   :  { %724 = vperm.xlu0 %1577, %v721_v2   ;;  %1047 = vmatpush1.bf16.msra.mxu0 %v1734_v12  ;;  %v74_v22 = vld [vmem:[#allocation6 + $0x60] sm:$0xff]  ;;  %v76_v24 = vld [vmem:[#allocation6 + $0x70] sm:$0xff]  ;;  %v83_v28 = vld [vmem:[#allocation6 + $0xa8] sm:$0xff] }
  0x2c   :  { %1175 = vmatpush1.bf16.msra.mxu1 %v1738_v16  ;;  %1049 = vmatprep.subr.bf16.mxu0 %v1740_v17  ;;  %v1747_v25 = vpack.c.bf16 %v74_v22, %v70_v20  ;;  %v1749_v26 = vpack.c.bf16 %v76_v24, %v72_v23  ;;  %v81_v29 = vld [vmem:[#allocation6 + $0x98] sm:$0xff]  ;;  %v1752_v30 = vpack.c.bf16 %v83_v28, %v79_v27  ;;  %v78_v32 = vld [vmem:[#allocation6 + $0x80] sm:$0xff]  ;;  %v80_v35 = vld [vmem:[#allocation6 + $0x90] sm:$0xff] }
  0x2d   :  { %1177 = vmatprep.subr.bf16.mxu1 %v1743_v21  ;;  %v85_v31 = vld [vmem:[#allocation6 + $0xb8] sm:$0xff]  ;;  %v82_v33 = vld [vmem:[#allocation6 + $0xa0] sm:$0xff]  ;;  %v84_v36 = vld [vmem:[#allocation6 + $0xb0] sm:$0xff] }
  0x2e   :  { %v1754_v34 = vpack.c.bf16 %v85_v31, %v81_v29  ;;  %v87_v37 = vld [vmem:[#allocation6 + $0xc8] sm:$0xff]  ;;  %v1757_v38 = vpack.c.bf16 %v82_v33, %v78_v32  ;;  %v89_v40 = vld [vmem:[#allocation6 + $0xd8] sm:$0xff]  ;;  %v1761_v42 = vpack.c.bf16 %v84_v36, %v80_v35  ;;  %v86_v44 = vld [vmem:[#allocation6 + $0xc0] sm:$0xff] }
  0x2f   :  { %1051 = vmatpush1.bf16.msra.mxu0 %v1747_v25  ;;  %v91_v39 = vld [vmem:[#allocation6 + $0xe8] sm:$0xff]  ;;  %v93_v41 = vld [vmem:[#allocation6 + $0xf8] sm:$0xff]  ;;  %v90_v45 = vld [vmem:[#allocation6 + $0xe0] sm:$0xff] }
  0x30   :  { %1179 = vmatpush1.bf16.msra.mxu1 %v1749_v26  ;;  %1053 = vmatprep.subr.bf16.mxu0 %v1752_v30  ;;  %v1763_v43 = vpack.c.bf16 %v91_v39, %v87_v37  ;;  %v88_v46 = vld [vmem:[#allocation6 + $0xd0] sm:$0xff]  ;;  %v1766_v47 = vpack.c.bf16 %v93_v41, %v89_v40  ;;  %v95_v49 = vld [vmem:[#allocation6 + $0x108] sm:$0xff]  ;;  %v97_v51 = vld [vmem:[#allocation6 + $0x118] sm:$0xff]  ;;  %v1769_v53 = vpack.c.bf16 %v90_v45, %v86_v44 }
  0x31   :  { %1181 = vmatprep.subr.bf16.mxu1 %v1754_v34  ;;  %v92_v48 = vld [vmem:[#allocation6 + $0xf0] sm:$0xff]  ;;  %v99_v50 = vld [vmem:[#allocation6 + $0x128] sm:$0xff]  ;;  %v101_v52 = vld [vmem:[#allocation6 + $0x138] sm:$0xff] }
  0x32   :  { %v1773_v54 = vpack.c.bf16 %v92_v48, %v88_v46  ;;  %v1775_v55 = vpack.c.bf16 %v99_v50, %v95_v49  ;;  %v94_v56 = vld [vmem:[#allocation6 + $0x100] sm:$0xff]  ;;  %v96_v58 = vld [vmem:[#allocation6 + $0x110] sm:$0xff]  ;;  %v1778_v59 = vpack.c.bf16 %v101_v52, %v97_v51  ;;  %v103_v61 = vld [vmem:[#allocation6 + $0x148] sm:$0xff] }
  0x33   :  { %1055 = vmatpush1.bf16.msra.mxu0 %v1757_v38  ;;  %v98_v57 = vld [vmem:[#allocation6 + $0x120] sm:$0xff]  ;;  %v100_v60 = vld [vmem:[#allocation6 + $0x130] sm:$0xff]  ;;  %v107_v62 = vld [vmem:[#allocation6 + $0x168] sm:$0xff] }
  0x34   :  { %1183 = vmatpush1.bf16.msra.mxu1 %v1761_v42  ;;  %1057 = vmatprep.subr.bf16.mxu0 %v1763_v43  ;;  %v105_v63 = vld [vmem:[#allocation6 + $0x158] sm:$0xff]  ;;  %v1781_v1 = vpack.c.bf16 %v98_v57, %v94_v56  ;;  %v1785_v2 = vpack.c.bf16 %v100_v60, %v96_v58  ;;  %v1787_v3 = vpack.c.bf16 %v107_v62, %v103_v61  ;;  %v102_v4 = vld [vmem:[#allocation6 + $0x140] sm:$0xff]  ;;  %v104_v6 = vld [vmem:[#allocation6 + $0x150] sm:$0xff] }
  0x35   :  { %1185 = vmatprep.subr.bf16.mxu1 %v1766_v47  ;;  %v109_v0 = vld [vmem:[#allocation6 + $0x178] sm:$0xff]  ;;  %v106_v5 = vld [vmem:[#allocation6 + $0x160] sm:$0xff]  ;;  %v108_v10 = vld [vmem:[#allocation6 + $0x170] sm:$0xff] }
  0x36   :  { %v1790_v9 = vpack.c.bf16 %v109_v0, %v105_v63  ;;  %v111_v11 = vld [vmem:[#allocation6 + $0x188] sm:$0xff]  ;;  %v113_v14 = vld [vmem:[#allocation6 + $0x198] sm:$0xff]  ;;  %v1793_v18 = vpack.c.bf16 %v106_v5, %v102_v4  ;;  %v1797_v19 = vpack.c.bf16 %v108_v10, %v104_v6  ;;  %v110_v22 = vld [vmem:[#allocation6 + $0x180] sm:$0xff] }
  0x37   :  { %1059 = vmatpush1.bf16.msra.mxu0 %v1769_v53  ;;  %v115_v13 = vld [vmem:[#allocation6 + $0x1a8] sm:$0xff]  ;;  %v117_v15 = vld [vmem:[#allocation6 + $0x1b8] sm:$0xff]  ;;  %v114_v23 = vld [vmem:[#allocation6 + $0x1a0] sm:$0xff] }
  0x38   :  { %1187 = vmatpush1.bf16.msra.mxu1 %v1773_v54  ;;  %1061 = vmatprep.subr.bf16.mxu0 %v1775_v55  ;;  %v1799_v20 = vpack.c.bf16 %v115_v13, %v111_v11  ;;  %v112_v24 = vld [vmem:[#allocation6 + $0x190] sm:$0xff]  ;;  %v1802_v27 = vpack.c.bf16 %v117_v15, %v113_v14  ;;  %v119_v29 = vld [vmem:[#allocation6 + $0x1c8] sm:$0xff]  ;;  %v121_v32 = vld [vmem:[#allocation6 + $0x1d8] sm:$0xff]  ;;  %v1805_v35 = vpack.c.bf16 %v114_v23, %v110_v22 }
  0x39   :  { %1189 = vmatprep.subr.bf16.mxu1 %v1778_v59  ;;  %v116_v28 = vld [vmem:[#allocation6 + $0x1b0] sm:$0xff]  ;;  %v123_v31 = vld [vmem:[#allocation6 + $0x1e8] sm:$0xff]  ;;  %v125_v33 = vld [vmem:[#allocation6 + $0x1f8] sm:$0xff] }
  0x3a   :  { %v1809_v36 = vpack.c.bf16 %v116_v28, %v112_v24  ;;  %v1811_v37 = vpack.c.bf16 %v123_v31, %v119_v29  ;;  %v118_v39 = vld [vmem:[#allocation6 + $0x1c0] sm:$0xff]  ;;  %v120_v41 = vld [vmem:[#allocation6 + $0x1d0] sm:$0xff]  ;;  %v1814_v44 = vpack.c.bf16 %v125_v33, %v121_v32  ;;  %v127_v46 = vld [vmem:[#allocation6 + $0x208] sm:$0xff] }
  0x3b   :  { %1063 = vmatpush1.bf16.msra.mxu0 %v1781_v1  ;;  %v122_v40 = vld [vmem:[#allocation6 + $0x1e0] sm:$0xff]  ;;  %v124_v45 = vld [vmem:[#allocation6 + $0x1f0] sm:$0xff]  ;;  %v131_v48 = vld [vmem:[#allocation6 + $0x228] sm:$0xff] }
  0x3c   :  { %1191 = vmatpush1.bf16.msra.mxu1 %v1785_v2  ;;  %1065 = vmatprep.subr.bf16.mxu0 %v1787_v3  ;;  %v129_v49 = vld [vmem:[#allocation6 + $0x218] sm:$0xff]  ;;  %v1817_v51 = vpack.c.bf16 %v122_v40, %v118_v39  ;;  %v1821_v52 = vpack.c.bf16 %v124_v45, %v120_v41  ;;  %v1823_v56 = vpack.c.bf16 %v131_v48, %v127_v46  ;;  %v126_v57 = vld [vmem:[#allocation6 + $0x200] sm:$0xff]  ;;  %v128_v60 = vld [vmem:[#allocation6 + $0x210] sm:$0xff] }
  0x3d   :  { %1193 = vmatprep.subr.bf16.mxu1 %v1790_v9  ;;  %v133_v50 = vld [vmem:[#allocation6 + $0x238] sm:$0xff]  ;;  %v130_v58 = vld [vmem:[#allocation6 + $0x220] sm:$0xff]  ;;  %v132_v62 = vld [vmem:[#allocation6 + $0x230] sm:$0xff] }
  0x3e   :  { %v1826_v61 = vpack.c.bf16 %v133_v50, %v129_v49  ;;  %v135_v63 = vld [vmem:[#allocation6 + $0x248] sm:$0xff]  ;;  %v137_v4 = vld [vmem:[#allocation6 + $0x258] sm:$0xff]  ;;  %v1829_v6 = vpack.c.bf16 %v130_v58, %v126_v57  ;;  %v1833_v10 = vpack.c.bf16 %v132_v62, %v128_v60  ;;  %v134_v13 = vld [vmem:[#allocation6 + $0x240] sm:$0xff] }
  0x3f   :  { %1067 = vmatpush1.bf16.msra.mxu0 %v1793_v18  ;;  %v139_v0 = vld [vmem:[#allocation6 + $0x268] sm:$0xff]  ;;  %v141_v5 = vld [vmem:[#allocation6 + $0x278] sm:$0xff]  ;;  %v138_v14 = vld [vmem:[#allocation6 + $0x260] sm:$0xff] }
  0x40   :  { %1195 = vmatpush1.bf16.msra.mxu1 %v1797_v19  ;;  %1069 = vmatprep.subr.bf16.mxu0 %v1799_v20  ;;  %v1835_v11 = vpack.c.bf16 %v139_v0, %v135_v63  ;;  %v136_v15 = vld [vmem:[#allocation6 + $0x250] sm:$0xff]  ;;  %v1838_v22 = vpack.c.bf16 %v141_v5, %v137_v4  ;;  %v143_v24 = vld [vmem:[#allocation6 + $0x288] sm:$0xff]  ;;  %v145_v29 = vld [vmem:[#allocation6 + $0x298] sm:$0xff]  ;;  %v1841_v32 = vpack.c.bf16 %v138_v14, %v134_v13 }
  0x41   :  { %1197 = vmatprep.subr.bf16.mxu1 %v1802_v27  ;;  %v140_v23 = vld [vmem:[#allocation6 + $0x270] sm:$0xff]  ;;  %v147_v28 = vld [vmem:[#allocation6 + $0x2a8] sm:$0xff]  ;;  %v149_v31 = vld [vmem:[#allocation6 + $0x2b8] sm:$0xff] }
  0x42   :  { %2385 = vst [vmem:[#allocation10_spill] sm:$0xff] %v1841_v32  ;;  %v1845_v33 = vpack.c.bf16 %v140_v23, %v136_v15  ;;  %v1847_v39 = vpack.c.bf16 %v147_v28, %v143_v24  ;;  %v142_v40 = vld [vmem:[#allocation6 + $0x280] sm:$0xff]  ;;  %v144_v45 = vld [vmem:[#allocation6 + $0x290] sm:$0xff]  ;;  %v1850_v46 = vpack.c.bf16 %v149_v31, %v145_v29  ;;  %v151_v49 = vld [vmem:[#allocation6 + $0x2c8] sm:$0xff] }
  0x43   :  { %1071 = vmatpush1.bf16.msra.mxu0 %v1805_v35  ;;  %v146_v41 = vld [vmem:[#allocation6 + $0x2a0] sm:$0xff]  ;;  %v148_v48 = vld [vmem:[#allocation6 + $0x2b0] sm:$0xff]  ;;  %v155_v50 = vld [vmem:[#allocation6 + $0x2e8] sm:$0xff] }
  0x44   :  { %1199 = vmatpush1.bf16.msra.mxu1 %v1809_v36  ;;  %1073 = vmatprep.subr.bf16.mxu0 %v1811_v37  ;;  %2386 = vst [vmem:[#allocation11_spill] sm:$0xff] %v1845_v33  ;;  %2387 = vst [vmem:[#allocation12_spill] sm:$0xff] %v1847_v39  ;;  %v153_v57 = vld [vmem:[#allocation6 + $0x2d8] sm:$0xff]  ;;  %v1853_v60 = vpack.c.bf16 %v146_v41, %v142_v40  ;;  %v1857_v62 = vpack.c.bf16 %v148_v48, %v144_v45  ;;  %v150_v0 = vld [vmem:[#allocation6 + $0x2c0] sm:$0xff] }
  0x45   :  { %1201 = vmatprep.subr.bf16.mxu1 %v1814_v44  ;;  %2388 = vst [vmem:[#allocation13_spill] sm:$0xff] %v1850_v46  ;;  %v157_v58 = vld [vmem:[#allocation6 + $0x2f8] sm:$0xff]  ;;  %v1859_v63 = vpack.c.bf16 %v155_v50, %v151_v49  ;;  %v154_v4 = vld [vmem:[#allocation6 + $0x2e0] sm:$0xff]  ;;  %v152_v5 = vld [vmem:[#allocation6 + $0x2d0] sm:$0xff] }
  0x46   :  { %2389 = vst [vmem:[#allocation14_spill] sm:$0xff] %v1853_v60  ;;  %2390 = vst [vmem:[#allocation15_spill] sm:$0xff] %v1857_v62  ;;  %v1862_v13 = vpack.c.bf16 %v157_v58, %v153_v57  ;;  %v156_v14 = vld [vmem:[#allocation6 + $0x2f0] sm:$0xff]  ;;  %v159_v15 = vld [vmem:[#allocation6 + $0x308] sm:$0xff]  ;;  %v1865_v29 = vpack.c.bf16 %v154_v4, %v150_v0 }
  0x47   :  { %1075 = vmatpush1.bf16.msra.mxu0 %v1817_v51  ;;  %2391 = vst [vmem:[#allocation16_spill] sm:$0xff] %v1859_v63  ;;  %v163_v23 = vld [vmem:[#allocation6 + $0x328] sm:$0xff]  ;;  %v161_v24 = vld [vmem:[#allocation6 + $0x318] sm:$0xff]  ;;  %v1869_v31 = vpack.c.bf16 %v156_v14, %v152_v5  ;;  %v158_v41 = vld [vmem:[#allocation6 + $0x300] sm:$0xff] }
  0x48   :  { %1203 = vmatpush1.bf16.msra.mxu1 %v1821_v52  ;;  %1077 = vmatprep.subr.bf16.mxu0 %v1823_v56  ;;  %2392 = vst [vmem:[#allocation17_spill] sm:$0xff] %v1862_v13  ;;  %v165_v28 = vld [vmem:[#allocation6 + $0x338] sm:$0xff]  ;;  %2393 = vst [vmem:[#allocation18_spill] sm:$0xff] %v1865_v29  ;;  %v1871_v40 = vpack.c.bf16 %v163_v23, %v159_v15  ;;  %v162_v45 = vld [vmem:[#allocation6 + $0x320] sm:$0xff] }
  0x49   :  { %1205 = vmatprep.subr.bf16.mxu1 %v1826_v61  ;;  %2394 = vst [vmem:[#allocation19_spill] sm:$0xff] %v1869_v31  ;;  %v160_v48 = vld [vmem:[#allocation6 + $0x310] sm:$0xff]  ;;  %v1874_v49 = vpack.c.bf16 %v165_v28, %v161_v24  ;;  %v167_v57 = vld [vmem:[#allocation6 + $0x348] sm:$0xff]  ;;  %v169_v0 = vld [vmem:[#allocation6 + $0x358] sm:$0xff] }
  0x4a   :  { %2395 = vst [vmem:[#allocation20_spill] sm:$0xff] %v1871_v40  ;;  %v164_v50 = vld [vmem:[#allocation6 + $0x330] sm:$0xff]  ;;  %v171_v58 = vld [vmem:[#allocation6 + $0x368] sm:$0xff]  ;;  %v173_v4 = vld [vmem:[#allocation6 + $0x378] sm:$0xff] }
  0x4b   :  { %1079 = vmatpush1.bf16.msra.mxu0 %v1829_v6  ;;  %2396 = vst [vmem:[#allocation21_spill] sm:$0xff] %v1874_v49  ;;  %v1881_v5 = vpack.c.bf16 %v164_v50, %v160_v48  ;;  %v1883_v14 = vpack.c.bf16 %v171_v58, %v167_v57  ;;  %v166_v15 = vld [vmem:[#allocation6 + $0x340] sm:$0xff]  ;;  %v168_v24 = vld [vmem:[#allocation6 + $0x350] sm:$0xff]  ;;  %v1886_v28 = vpack.c.bf16 %v173_v4, %v169_v0 }
  0x4c   :  { %1207 = vmatpush1.bf16.msra.mxu1 %v1833_v10  ;;  %1081 = vmatprep.subr.bf16.mxu0 %v1835_v11  ;;  %v170_v23 = vld [vmem:[#allocation6 + $0x360] sm:$0xff]  ;;  %v176_v0 = vld [vmem:[#allocation6 + $0x390] sm:$0xff] }
  0x4d   :  { %1209 = vmatprep.subr.bf16.mxu1 %v1838_v22  ;;  %2398 = vst [vmem:[#allocation23_spill] sm:$0xff] %v1881_v5  ;;  %2399 = vst [vmem:[#allocation24_spill] sm:$0xff] %v1883_v14  ;;  %v174_v57 = vld [vmem:[#allocation6 + $0x380] sm:$0xff] }
  0x4e   :  { %2400 = vst [vmem:[#allocation25_spill] sm:$0xff] %v1886_v28  ;;  %v178_v58 = vld [vmem:[#allocation6 + $0x3a0] sm:$0xff] }
  0x4f   :  { %1083 = vmatpush1.bf16.msra.mxu0 %v1841_v32 }
  0x50   :  { %1211 = vmatpush1.bf16.msra.mxu1 %v1845_v33  ;;  %1085 = vmatprep.subr.bf16.mxu0 %v1847_v39 }
  0x51   :  { %1213 = vmatprep.subr.bf16.mxu1 %v1850_v46 }
  0x53   :  { %1087 = vmatpush1.bf16.msra.mxu0 %v1853_v60 }
  0x54   :  { %1215 = vmatpush1.bf16.msra.mxu1 %v1857_v62  ;;  %1089 = vmatprep.subr.bf16.mxu0 %v1859_v63  ;;  %v1877_v62 = vpack.c.bf16 %v162_v45, %v158_v41  ;;  %v175_v63 = vld [vmem:[#allocation6 + $0x388] sm:$0xff]  ;;  %v177_v41 = vld [vmem:[#allocation6 + $0x398] sm:$0xff] }
  0x55   :  { %1217 = vmatprep.subr.bf16.mxu1 %v1862_v13  ;;  %v172_v13 = vld [vmem:[#allocation6 + $0x370] sm:$0xff]  ;;  %v181_v45 = vld [vmem:[#allocation6 + $0x3b8] sm:$0xff] }
  0x56   :  { %2397 = vst [vmem:[#allocation22_spill] sm:$0xff] %v1877_v62  ;;  %v1893_v48 = vpack.c.bf16 %v172_v13, %v168_v24  ;;  %v1898_v4 = vpack.c.bf16 %v181_v45, %v177_v41  ;;  %v186_v24 = vld [vmem:[#allocation6 + $0x3e0] sm:$0xff]  ;;  %v184_v41 = vld [vmem:[#allocation6 + $0x3d0] sm:$0xff] }
  0x57   :  { %1091 = vmatpush1.bf16.msra.mxu0 %v1865_v29  ;;  %v179_v29 = vld [vmem:[#allocation6 + $0x3a8] sm:$0xff] }
  0x58   :  { %1219 = vmatpush1.bf16.msra.mxu1 %v1869_v31  ;;  %1093 = vmatprep.subr.bf16.mxu0 %v1871_v40  ;;  %v1889_v31 = vpack.c.bf16 %v170_v23, %v166_v15  ;;  %2402 = vst [vmem:[#allocation27_spill] sm:$0xff] %v1893_v48  ;;  %v1895_v50 = vpack.c.bf16 %v179_v29, %v175_v63  ;;  %2404 = vst [vmem:[#allocation29_spill] sm:$0xff] %v1898_v4  ;;  %v183_v40 = vld [vmem:[#allocation6 + $0x3c8] sm:$0xff]  ;;  %v185_v15 = vld [vmem:[#allocation6 + $0x3d8] sm:$0xff] }
  0x59   :  { %1221 = vmatprep.subr.bf16.mxu1 %v1874_v49  ;;  %v180_v49 = vld [vmem:[#allocation6 + $0x3b0] sm:$0xff]  ;;  %v189_v23 = vld [vmem:[#allocation6 + $0x3f8] sm:$0xff]  ;;  %v182_v29 = vld [vmem:[#allocation6 + $0x3c0] sm:$0xff] }
  0x5a   :  { %2401 = vst [vmem:[#allocation26_spill] sm:$0xff] %v1889_v31  ;;  %2403 = vst [vmem:[#allocation28_spill] sm:$0xff] %v1895_v50  ;;  %v1905_v63 = vpack.c.bf16 %v180_v49, %v176_v0  ;;  %v1910_v45 = vpack.c.bf16 %v189_v23, %v185_v15  ;;  %v325_v0 = vlaneseq  ;;  %v56_v15 = vld [vmem:[#allocation4] ss:$8 sm:$0xf] }
  0x5b   :  { %1095 = vmatpush1.bf16.msra.mxu0 %v1877_v62  ;;  %v187_v62 = vld [vmem:[#allocation6 + $0x3e8] sm:$0xff] }
  0x5c   :  { %1223 = vmatpush1.bf16.msra.mxu1 %v1881_v5  ;;  %1097 = vmatprep.subr.bf16.mxu0 %v1883_v14  ;;  %v1901_v5 = vpack.c.bf16 %v178_v58, %v174_v57  ;;  %2406 = vst [vmem:[#allocation31_spill] sm:$0xff] %v1905_v63  ;;  %v1907_v13 = vpack.c.bf16 %v187_v62, %v183_v40  ;;  %2408 = vst [vmem:[#allocation33_spill] sm:$0xff] %v1910_v45  ;;  %v191_v14 = vld [vmem:[#allocation6 + $0x408] sm:$0xff]  ;;  %v193_v57 = vld [vmem:[#allocation6 + $0x418] sm:$0xff] }
  0x5d   :  { %1225 = vmatprep.subr.bf16.mxu1 %v1886_v28  ;;  %v188_v28 = vld [vmem:[#allocation6 + $0x3f0] sm:$0xff]  ;;  %v197_v58 = vld [vmem:[#allocation6 + $0x438] sm:$0xff] }
  0x5e   :  { %2405 = vst [vmem:[#allocation30_spill] sm:$0xff] %v1901_v5  ;;  %2407 = vst [vmem:[#allocation32_spill] sm:$0xff] %v1907_v13  ;;  %v1917_v62 = vpack.c.bf16 %v188_v28, %v184_v41  ;;  %v1922_v49 = vpack.c.bf16 %v197_v58, %v193_v57  ;;  %v57_v28 = vstv %s2293_s0  ;;  %v60_v23 = vld [vmem:[#allocation4 + $0x2] ss:$8 sm:$0xf] }
  0x5f   :  { %1099 = vmatpush1.bf16.msra.mxu0 %v1889_v31  ;;  %v195_v31 = vld [vmem:[#allocation6 + $0x428] sm:$0xff] }
  0x60   :  { %1227 = vmatpush1.bf16.msra.mxu1 %v1893_v48  ;;  %1101 = vmatprep.subr.bf16.mxu0 %v1895_v50  ;;  %v1913_v48 = vpack.c.bf16 %v186_v24, %v182_v29  ;;  %2410 = vst [vmem:[#allocation35_spill] sm:$0xff] %v1917_v62  ;;  %v1919_v40 = vpack.c.bf16 %v195_v31, %v191_v14  ;;  %2412 = vst [vmem:[#allocation37_spill] sm:$0xff] %v1922_v49  ;;  %v326_v31 = vshrl.u32 %v325_v0, 7  ;;  %v51_v58 = vld [vmem:[#allocation4 + $0x1] ss:$8 sm:$0xf] }
  0x61   :  { %1229 = vmatprep.subr.bf16.mxu1 %v1898_v4  ;;  %v58_v14 = vmul.f32 %v57_v28, %v56_v15 }
  0x62   :  { %2409 = vst [vmem:[#allocation34_spill] sm:$0xff] %v1913_v48  ;;  %2411 = vst [vmem:[#allocation36_spill] sm:$0xff] %v1919_v40  ;;  %v1931_v29 = vsub.s32 0, %v326_v31  ;;  %v1933_v24 = vsub.s32 1, %v326_v31  ;;  %v1935_v41 = vsub.s32 2, %v326_v31  ;;  %v1937_v57 = vsub.s32 3, %v326_v31 }
  0x63   :  { %1103 = vmatpush1.bf16.msra.mxu0 %v1901_v5 }
  0x64   :  { %1231 = vmatpush1.bf16.msra.mxu1 %v1905_v63  ;;  %1105 = vmatprep.subr.bf16.mxu0 %v1907_v13  ;;  %2413 = vst [vmem:[#allocation38_spill] sm:$0xff] %v1931_v29  ;;  %2414 = vst [vmem:[#allocation39_spill] sm:$0xff] %v1933_v24  ;;  %v340_v0 = vrot.slane %v51_v58, %v1937_v57 }
  0x65   :  { %1233 = vmatprep.subr.bf16.mxu1 %v1910_v45  ;;  %2415 = vst [vmem:[#allocation40_spill] sm:$0xff] %v1935_v41  ;;  %2416 = vst [vmem:[#allocation41_spill] sm:$0xff] %v1937_v57 }
  0x67   :  { %1107 = vmatpush1.bf16.msra.mxu0 %v1913_v48  ;;  %v336_v48 = vrot.slane %v51_v58, %v1935_v41 }
  0x68   :  { %1235 = vmatpush1.bf16.msra.mxu1 %v1917_v62  ;;  %1109 = vmatprep.subr.bf16.mxu0 %v1919_v40  ;;  %v61_v40 = vadd.f32 %v60_v23, %v58_v14  ;;  %v332_v62 = vrot.slane %v51_v58, %v1933_v24 }
  0x69   :  { %1237 = vmatprep.subr.bf16.mxu1 %v1922_v49  ;;  %v328_v49 = vrot.slane %v51_v58, %v1931_v29 }
  0x6a   :  { %v353_v28 = vrot.slane %v61_v40, %v1931_v29  ;;  %v357_v15 = vrot.slane %v61_v40, %v1933_v24  ;;  %v361_v45 = vrot.slane %v61_v40, %v1935_v41  ;;  %v365_v31 = vrot.slane %v61_v40, %v1937_v57 }
  0xa6   :  { %v322_v13 = vpop.permute.xlu0 %321 }
  0xa7   :  { %v345_v63 = vmul.f32 %v328_v49, %v322_v13  ;;  %v346_v5 = vmul.f32 %v332_v62, %v322_v13  ;;  %v347_v14 = vmul.f32 %v336_v48, %v322_v13  ;;  %v348_v23 = vmul.f32 %v340_v0, %v322_v13  ;;  %v192_v13 = vld [vmem:[#allocation6 + $0x410] sm:$0xff] }
  0xa9   :  { %v370_v4 = vadd.f32 %v353_v28, %v345_v63  ;;  %v371_v50 = vadd.f32 %v357_v15, %v346_v5  ;;  %v1947_v60 = vadd.f32 %v361_v45, %v347_v14  ;;  %v373_v39 = vadd.f32 %v365_v31, %v348_v23  ;;  %v190_v5 = vld [vmem:[#allocation6 + $0x400] sm:$0xff]  ;;  %v196_v14 = vld [vmem:[#allocation6 + $0x430] sm:$0xff]  ;;  %v199_v23 = vld [vmem:[#allocation6 + $0x448] sm:$0xff] }
  0xaa   :  { %v725_v46 = vpop.permute.xlu0 %724  ;;  %v194_v63 = vld [vmem:[#allocation6 + $0x420] sm:$0xff] }
  0xab   :  { %1578 = vtanh.f32 %v370_v4  ;;  %v727_v58 = vmul.f32 %v725_v46, %v328_v49  ;;  %v728_v29 = vmul.f32 %v725_v46, %v332_v62  ;;  %v729_v33 = vmul.f32 %v725_v46, %v336_v48  ;;  %v203_v4 = vld [vmem:[#allocation6 + $0x468] sm:$0xff]  ;;  %v201_v49 = vld [vmem:[#allocation6 + $0x458] sm:$0xff] }
  0xac   :  { %1580 = vtanh.f32 %v371_v50  ;;  %v730_v24 = vmul.f32 %v725_v46, %v340_v0  ;;  %v205_v62 = vld [vmem:[#allocation6 + $0x478] sm:$0xff]  ;;  %v1957_v50 = vpack.c.bf16 %v194_v63, %v190_v5  ;;  %v1959_v46 = vpack.c.bf16 %v196_v14, %v192_v13  ;;  %v202_v0 = vld [vmem:[#allocation6 + $0x460] sm:$0xff] }
  0xad   :  { %v1949_v41 = vadd.f32 %v727_v58, %v353_v28  ;;  %v1951_v32 = vadd.f32 %v728_v29, %v357_v15  ;;  %v1953_v40 = vadd.f32 %v729_v33, %v361_v45  ;;  %1582 = vtanh.f32 %v373_v39  ;;  %v198_v29 = vld [vmem:[#allocation6 + $0x440] sm:$0xff]  ;;  %v200_v45 = vld [vmem:[#allocation6 + $0x450] sm:$0xff]  ;;  %v207_v28 = vld [vmem:[#allocation6 + $0x488] sm:$0xff] }
  0xae   :  { %v1955_v57 = vadd.f32 %v730_v24, %v365_v31  ;;  %2418 = vst [vmem:[#allocation43_spill] sm:$0xff] %v1957_v50  ;;  %2419 = vst [vmem:[#allocation44_spill] sm:$0xff] %v1959_v46  ;;  %v204_v24 = vld [vmem:[#allocation6 + $0x470] sm:$0xff]  ;;  %v1961_v39 = vpack.c.bf16 %v203_v4, %v199_v23  ;;  %v1963_v15 = vpack.c.bf16 %v205_v62, %v201_v49  ;;  %v211_v31 = vld [vmem:[#allocation6 + $0x4a8] sm:$0xff]  ;;  %1584 = vtanh.f32 %v1947_v60 }
  0xaf   :  { %2417 = vst [vmem:[#allocation42_spill] sm:$0xff] %v1953_v40  ;;  %v209_v58 = vld [vmem:[#allocation6 + $0x498] sm:$0xff]  ;;  %v1967_v63 = vpack.c.bf16 %v202_v0, %v198_v29  ;;  %v1969_v13 = vpack.c.bf16 %v204_v24, %v200_v45  ;;  %v206_v14 = vld [vmem:[#allocation6 + $0x480] sm:$0xff]  ;;  %v1971_v23 = vpack.c.bf16 %v211_v31, %v207_v28  ;;  %v208_v49 = vld [vmem:[#allocation6 + $0x490] sm:$0xff]  ;;  %1586 = vtanh.f32 %v1951_v32 }
  0xb0   :  { %2420 = vst [vmem:[#allocation45_spill] sm:$0xff] %v1961_v39  ;;  %2421 = vst [vmem:[#allocation46_spill] sm:$0xff] %v1963_v15  ;;  %v213_v40 = vld [vmem:[#allocation6 + $0x4b8] sm:$0xff]  ;;  %v212_v62 = vld [vmem:[#allocation6 + $0x4b0] sm:$0xff]  ;;  %1588 = vtanh.f32 %v1949_v41 }
  0xb1   :  { %2422 = vst [vmem:[#allocation47_spill] sm:$0xff] %v1967_v63  ;;  %2423 = vst [vmem:[#allocation48_spill] sm:$0xff] %v1969_v13  ;;  %v1973_v4 = vpack.c.bf16 %v213_v40, %v209_v58  ;;  %v217_v29 = vld [vmem:[#allocation6 + $0x4d8] sm:$0xff]  ;;  %v1981_v24 = vpack.c.bf16 %v212_v62, %v208_v49  ;;  %v214_v40 = vld [vmem:[#allocation6 + $0x4c0] sm:$0xff]  ;;  %1590 = vtanh.f32 %v1955_v57 }
  0xb2   :  { %2424 = vst [vmem:[#allocation49_spill] sm:$0xff] %v1971_v23  ;;  %v221_v0 = vld [vmem:[#allocation6 + $0x4f8] sm:$0xff]  ;;  %v218_v28 = vld [vmem:[#allocation6 + $0x4e0] sm:$0xff] }
  0xb3   :  { %2425 = vst [vmem:[#allocation50_spill] sm:$0xff] %v1973_v4  ;;  %2427 = vst [vmem:[#allocation52_spill] sm:$0xff] %v1981_v24  ;;  %v1987_v58 = vpack.c.bf16 %v221_v0, %v217_v29  ;;  %v222_v49 = vld [vmem:[#allocation6 + $0x500] sm:$0xff]  ;;  %v224_v29 = vld [vmem:[#allocation6 + $0x510] sm:$0xff] }
  0xb4   :  { %v226_v62 = vld [vmem:[#allocation6 + $0x520] sm:$0xff]  ;;  %v228_v0 = vld [vmem:[#allocation6 + $0x530] sm:$0xff] }
  0xb5   :  { %v1579_v48 = vpop.eup %1578  ;;  %2429 = vst [vmem:[#allocation54_spill] sm:$0xff] %v1987_v58  ;;  %v314_v60 = vld [vmem:[#allocation6 + $0x7e0] sm:$0xff] }
  0xb6   :  { %v1581_v33 = vpop.eup %1580 }
  0xb7   :  { %463 = vmatprep.mubr.f32.mxu0 %v1581_v33  ;;  %605 = vmatprep.mubr.f32.mxu1 %v1581_v33  ;;  %v1583_v5 = vpop.eup %1582  ;;  %v210_v33 = vld [vmem:[#allocation6 + $0x4a0] sm:$0xff] }
  0xb8   :  { %464 = vmatmul.mubr.f32.vlgmr.msra.gmra.mrb[0].mxu0 %v1579_v48  ;;  %606 = vmatmul.mubr.f32.vlgmr.msra.gmra.mrb[0].mxu1 %v1579_v48  ;;  %v215_v48 = vld [vmem:[#allocation6 + $0x4c8] sm:$0xff]  ;;  %v1979_v45 = vpack.c.bf16 %v210_v33, %v206_v14  ;;  %v1991_v14 = vpack.c.bf16 %v218_v28, %v214_v40  ;;  %v2005_v40 = vpack.c.bf16 %v228_v0, %v224_v29  ;;  %v230_v28 = vld [vmem:[#allocation6 + $0x540] sm:$0xff]  ;;  %v1585_v32 = vpop.eup %1584 }
  0xb9   :  { %1111 = vmatpush1.bf16.msra.mxu0 %v1957_v50  ;;  %1239 = vmatpush1.bf16.msra.mxu1 %v1959_v46  ;;  %v219_v46 = vld [vmem:[#allocation6 + $0x4e8] sm:$0xff]  ;;  %v225_v50 = vld [vmem:[#allocation6 + $0x518] sm:$0xff]  ;;  %v238_v29 = vld [vmem:[#allocation6 + $0x580] sm:$0xff] }
  0xba   :  { %534 = vmatprep.mubr.f32.mxu0 %v1583_v5  ;;  %676 = vmatprep.mubr.f32.mxu1 %v1583_v5  ;;  %2426 = vst [vmem:[#allocation51_spill] sm:$0xff] %v1979_v45  ;;  %v1985_v31 = vpack.c.bf16 %v219_v46, %v215_v48  ;;  %v216_v5 = vld [vmem:[#allocation6 + $0x4d0] sm:$0xff]  ;;  %2430 = vst [vmem:[#allocation55_spill] sm:$0xff] %v1991_v14  ;;  %v242_v0 = vld [vmem:[#allocation6 + $0x5a0] sm:$0xff] }
  0xbb   :  { %1113 = vmatprep.subr.bf16.mxu0 %v1961_v39  ;;  %1241 = vmatprep.subr.bf16.mxu1 %v1963_v15  ;;  %v220_v15 = vld [vmem:[#allocation6 + $0x4f0] sm:$0xff]  ;;  %v223_v39 = vld [vmem:[#allocation6 + $0x508] sm:$0xff]  ;;  %2435 = vst [vmem:[#allocation60_spill] sm:$0xff] %v2005_v40 }
  0xbc   :  { %2428 = vst [vmem:[#allocation53_spill] sm:$0xff] %v1985_v31  ;;  %v1993_v33 = vpack.c.bf16 %v220_v15, %v216_v5  ;;  %v2003_v15 = vpack.c.bf16 %v226_v62, %v222_v49  ;;  %v234_v5 = vld [vmem:[#allocation6 + $0x560] sm:$0xff]  ;;  %v2505_v57 = vld [vmem:[#allocation52_spill] sm:$0xff] }
  0xbd   :  { %1115 = vmatpush1.bf16.msra.mxu0 %v1967_v63  ;;  %1243 = vmatpush1.bf16.msra.mxu1 %v1969_v13  ;;  %v227_v63 = vld [vmem:[#allocation6 + $0x528] sm:$0xff]  ;;  %v229_v13 = vld [vmem:[#allocation6 + $0x538] sm:$0xff]  ;;  %v2015_v49 = vpack.c.bf16 %v234_v5, %v230_v28  ;;  %v2027_v28 = vpack.c.bf16 %v242_v0, %v238_v29 }
  0xbe   :  { %1117 = vmatprep.subr.bf16.mxu0 %v1971_v23  ;;  %1245 = vmatprep.subr.bf16.mxu1 %v1973_v4  ;;  %2431 = vst [vmem:[#allocation56_spill] sm:$0xff] %v1993_v33  ;;  %v1997_v46 = vpack.c.bf16 %v227_v63, %v223_v39  ;;  %v1999_v48 = vpack.c.bf16 %v229_v13, %v225_v50  ;;  %v231_v4 = vld [vmem:[#allocation6 + $0x548] sm:$0xff]  ;;  %v233_v23 = vld [vmem:[#allocation6 + $0x558] sm:$0xff]  ;;  %2434 = vst [vmem:[#allocation59_spill] sm:$0xff] %v2003_v15 }
  0xbf   :  { %v232_v63 = vld [vmem:[#allocation6 + $0x550] sm:$0xff]  ;;  %2438 = vst [vmem:[#allocation63_spill] sm:$0xff] %v2015_v49  ;;  %2442 = vst [vmem:[#allocation67_spill] sm:$0xff] %v2027_v28 }
  0xc0   :  { %2432 = vst [vmem:[#allocation57_spill] sm:$0xff] %v1997_v46  ;;  %2433 = vst [vmem:[#allocation58_spill] sm:$0xff] %v1999_v48  ;;  %v236_v13 = vld [vmem:[#allocation6 + $0x570] sm:$0xff] }
  0xc1   :  { %1119 = vmatpush1.bf16.msra.mxu0 %v1979_v45  ;;  %1247 = vmatpush1.bf16.msra.mxu1 %v1981_v24  ;;  %v235_v45 = vld [vmem:[#allocation6 + $0x568] sm:$0xff]  ;;  %v237_v24 = vld [vmem:[#allocation6 + $0x578] sm:$0xff]  ;;  %v2017_v62 = vpack.c.bf16 %v236_v13, %v232_v63  ;;  %v246_v63 = vld [vmem:[#allocation6 + $0x5c0] sm:$0xff] }
  0xc2   :  { %1121 = vmatprep.subr.bf16.mxu0 %v1985_v31  ;;  %1249 = vmatprep.subr.bf16.mxu1 %v1987_v58  ;;  %v2009_v50 = vpack.c.bf16 %v235_v45, %v231_v4  ;;  %v2011_v39 = vpack.c.bf16 %v237_v24, %v233_v23  ;;  %v239_v58 = vld [vmem:[#allocation6 + $0x588] sm:$0xff]  ;;  %v241_v31 = vld [vmem:[#allocation6 + $0x598] sm:$0xff]  ;;  %v240_v45 = vld [vmem:[#allocation6 + $0x590] sm:$0xff] }
  0xc3   :  { %2439 = vst [vmem:[#allocation64_spill] sm:$0xff] %v2017_v62  ;;  %v244_v24 = vld [vmem:[#allocation6 + $0x5b0] sm:$0xff]  ;;  %v250_v13 = vld [vmem:[#allocation6 + $0x5e0] sm:$0xff]  ;;  %v2504_v41 = vld [vmem:[#allocation51_spill] sm:$0xff] }
  0xc4   :  { %2436 = vst [vmem:[#allocation61_spill] sm:$0xff] %v2009_v50  ;;  %2437 = vst [vmem:[#allocation62_spill] sm:$0xff] %v2011_v39  ;;  %v2029_v5 = vpack.c.bf16 %v244_v24, %v240_v45  ;;  %v2039_v29 = vpack.c.bf16 %v250_v13, %v246_v63  ;;  %v254_v45 = vld [vmem:[#allocation6 + $0x600] sm:$0xff] }
  0xc5   :  { %1123 = vmatpush1.bf16.msra.mxu0 %v1991_v14  ;;  %1251 = vmatpush1.bf16.msra.mxu1 %v1993_v33  ;;  %v243_v14 = vld [vmem:[#allocation6 + $0x5a8] sm:$0xff]  ;;  %v245_v33 = vld [vmem:[#allocation6 + $0x5b8] sm:$0xff]  ;;  %v258_v24 = vld [vmem:[#allocation6 + $0x620] sm:$0xff] }
  0xc6   :  { %1125 = vmatprep.subr.bf16.mxu0 %v1997_v46  ;;  %1253 = vmatprep.subr.bf16.mxu1 %v1999_v48  ;;  %v2021_v23 = vpack.c.bf16 %v243_v14, %v239_v58  ;;  %v2023_v4 = vpack.c.bf16 %v245_v33, %v241_v31  ;;  %v247_v48 = vld [vmem:[#allocation6 + $0x5c8] sm:$0xff]  ;;  %v249_v46 = vld [vmem:[#allocation6 + $0x5d8] sm:$0xff]  ;;  %2443 = vst [vmem:[#allocation68_spill] sm:$0xff] %v2029_v5  ;;  %v248_v14 = vld [vmem:[#allocation6 + $0x5d0] sm:$0xff] }
  0xc7   :  { %v252_v33 = vld [vmem:[#allocation6 + $0x5f0] sm:$0xff]  ;;  %2446 = vst [vmem:[#allocation71_spill] sm:$0xff] %v2039_v29  ;;  %v2051_v63 = vpack.c.bf16 %v258_v24, %v254_v45 }
  0xc8   :  { %2440 = vst [vmem:[#allocation65_spill] sm:$0xff] %v2021_v23  ;;  %2441 = vst [vmem:[#allocation66_spill] sm:$0xff] %v2023_v4  ;;  %v2041_v0 = vpack.c.bf16 %v252_v33, %v248_v14  ;;  %v262_v14 = vld [vmem:[#allocation6 + $0x640] sm:$0xff] }
  0xc9   :  { %1127 = vmatpush1.bf16.msra.mxu0 %v2003_v15  ;;  %1255 = vmatpush1.bf16.msra.mxu1 %v2005_v40  ;;  %v251_v15 = vld [vmem:[#allocation6 + $0x5e8] sm:$0xff]  ;;  %v253_v40 = vld [vmem:[#allocation6 + $0x5f8] sm:$0xff]  ;;  %2450 = vst [vmem:[#allocation75_spill] sm:$0xff] %v2051_v63  ;;  %v266_v33 = vld [vmem:[#allocation6 + $0x660] sm:$0xff] }
  0xca   :  { %1129 = vmatprep.subr.bf16.mxu0 %v2009_v50  ;;  %1257 = vmatprep.subr.bf16.mxu1 %v2011_v39  ;;  %v2033_v31 = vpack.c.bf16 %v251_v15, %v247_v48  ;;  %v2035_v58 = vpack.c.bf16 %v253_v40, %v249_v46  ;;  %v255_v39 = vld [vmem:[#allocation6 + $0x608] sm:$0xff]  ;;  %v257_v50 = vld [vmem:[#allocation6 + $0x618] sm:$0xff]  ;;  %2447 = vst [vmem:[#allocation72_spill] sm:$0xff] %v2041_v0  ;;  %v256_v15 = vld [vmem:[#allocation6 + $0x610] sm:$0xff] }
  0xcb   :  { %v260_v40 = vld [vmem:[#allocation6 + $0x630] sm:$0xff]  ;;  %v2063_v45 = vpack.c.bf16 %v266_v33, %v262_v14 }
  0xcc   :  { %2444 = vst [vmem:[#allocation69_spill] sm:$0xff] %v2033_v31  ;;  %2445 = vst [vmem:[#allocation70_spill] sm:$0xff] %v2035_v58  ;;  %v2053_v13 = vpack.c.bf16 %v260_v40, %v256_v15  ;;  %v270_v15 = vld [vmem:[#allocation6 + $0x680] sm:$0xff] }
  0xcd   :  { %1131 = vmatpush1.bf16.msra.mxu0 %v2015_v49  ;;  %1259 = vmatpush1.bf16.msra.mxu1 %v2017_v62  ;;  %v259_v49 = vld [vmem:[#allocation6 + $0x628] sm:$0xff]  ;;  %v261_v62 = vld [vmem:[#allocation6 + $0x638] sm:$0xff]  ;;  %2454 = vst [vmem:[#allocation79_spill] sm:$0xff] %v2063_v45  ;;  %v274_v40 = vld [vmem:[#allocation6 + $0x6a0] sm:$0xff] }
  0xce   :  { %1133 = vmatprep.subr.bf16.mxu0 %v2021_v23  ;;  %1261 = vmatprep.subr.bf16.mxu1 %v2023_v4  ;;  %v2045_v46 = vpack.c.bf16 %v259_v49, %v255_v39  ;;  %v2047_v48 = vpack.c.bf16 %v261_v62, %v257_v50  ;;  %v263_v4 = vld [vmem:[#allocation6 + $0x648] sm:$0xff]  ;;  %v265_v23 = vld [vmem:[#allocation6 + $0x658] sm:$0xff]  ;;  %2451 = vst [vmem:[#allocation76_spill] sm:$0xff] %v2053_v13  ;;  %v264_v49 = vld [vmem:[#allocation6 + $0x650] sm:$0xff] }
  0xcf   :  { %v268_v62 = vld [vmem:[#allocation6 + $0x670] sm:$0xff]  ;;  %v2075_v14 = vpack.c.bf16 %v274_v40, %v270_v15 }
  0xd0   :  { %2448 = vst [vmem:[#allocation73_spill] sm:$0xff] %v2045_v46  ;;  %2449 = vst [vmem:[#allocation74_spill] sm:$0xff] %v2047_v48  ;;  %v2065_v24 = vpack.c.bf16 %v268_v62, %v264_v49  ;;  %v278_v49 = vld [vmem:[#allocation6 + $0x6c0] sm:$0xff] }
  0xd1   :  { %1135 = vmatpush1.bf16.msra.mxu0 %v2027_v28  ;;  %1263 = vmatpush1.bf16.msra.mxu1 %v2029_v5  ;;  %v267_v28 = vld [vmem:[#allocation6 + $0x668] sm:$0xff]  ;;  %v269_v5 = vld [vmem:[#allocation6 + $0x678] sm:$0xff]  ;;  %2458 = vst [vmem:[#allocation83_spill] sm:$0xff] %v2075_v14  ;;  %v282_v62 = vld [vmem:[#allocation6 + $0x6e0] sm:$0xff] }
  0xd2   :  { %1137 = vmatprep.subr.bf16.mxu0 %v2033_v31  ;;  %1265 = vmatprep.subr.bf16.mxu1 %v2035_v58  ;;  %v2057_v50 = vpack.c.bf16 %v267_v28, %v263_v4  ;;  %v2059_v39 = vpack.c.bf16 %v269_v5, %v265_v23  ;;  %v271_v58 = vld [vmem:[#allocation6 + $0x688] sm:$0xff]  ;;  %v273_v31 = vld [vmem:[#allocation6 + $0x698] sm:$0xff]  ;;  %2455 = vst [vmem:[#allocation80_spill] sm:$0xff] %v2065_v24  ;;  %v272_v28 = vld [vmem:[#allocation6 + $0x690] sm:$0xff] }
  0xd3   :  { %v276_v5 = vld [vmem:[#allocation6 + $0x6b0] sm:$0xff]  ;;  %v2087_v15 = vpack.c.bf16 %v282_v62, %v278_v49 }
  0xd4   :  { %2452 = vst [vmem:[#allocation77_spill] sm:$0xff] %v2057_v50  ;;  %2453 = vst [vmem:[#allocation78_spill] sm:$0xff] %v2059_v39  ;;  %v2077_v33 = vpack.c.bf16 %v276_v5, %v272_v28  ;;  %v286_v28 = vld [vmem:[#allocation6 + $0x700] sm:$0xff] }
  0xd5   :  { %1139 = vmatpush1.bf16.msra.mxu0 %v2039_v29  ;;  %1267 = vmatpush1.bf16.msra.mxu1 %v2041_v0  ;;  %v275_v29 = vld [vmem:[#allocation6 + $0x6a8] sm:$0xff]  ;;  %v277_v0 = vld [vmem:[#allocation6 + $0x6b8] sm:$0xff]  ;;  %2462 = vst [vmem:[#allocation87_spill] sm:$0xff] %v2087_v15  ;;  %v290_v5 = vld [vmem:[#allocation6 + $0x720] sm:$0xff] }
  0xd6   :  { %1141 = vmatprep.subr.bf16.mxu0 %v2045_v46  ;;  %1269 = vmatprep.subr.bf16.mxu1 %v2047_v48  ;;  %v2069_v23 = vpack.c.bf16 %v275_v29, %v271_v58  ;;  %v2071_v4 = vpack.c.bf16 %v277_v0, %v273_v31  ;;  %v279_v48 = vld [vmem:[#allocation6 + $0x6c8] sm:$0xff]  ;;  %v281_v46 = vld [vmem:[#allocation6 + $0x6d8] sm:$0xff]  ;;  %2459 = vst [vmem:[#allocation84_spill] sm:$0xff] %v2077_v33  ;;  %v280_v29 = vld [vmem:[#allocation6 + $0x6d0] sm:$0xff] }
  0xd7   :  { %v284_v0 = vld [vmem:[#allocation6 + $0x6f0] sm:$0xff]  ;;  %v2099_v49 = vpack.c.bf16 %v290_v5, %v286_v28 }
  0xd8   :  { %2456 = vst [vmem:[#allocation81_spill] sm:$0xff] %v2069_v23  ;;  %2457 = vst [vmem:[#allocation82_spill] sm:$0xff] %v2071_v4  ;;  %v2089_v40 = vpack.c.bf16 %v284_v0, %v280_v29  ;;  %v294_v29 = vld [vmem:[#allocation6 + $0x740] sm:$0xff] }
  0xd9   :  { %1143 = vmatpush1.bf16.msra.mxu0 %v2051_v63  ;;  %1271 = vmatpush1.bf16.msra.mxu1 %v2053_v13  ;;  %v283_v63 = vld [vmem:[#allocation6 + $0x6e8] sm:$0xff]  ;;  %v285_v13 = vld [vmem:[#allocation6 + $0x6f8] sm:$0xff]  ;;  %2466 = vst [vmem:[#allocation91_spill] sm:$0xff] %v2099_v49  ;;  %v298_v0 = vld [vmem:[#allocation6 + $0x760] sm:$0xff] }
  0xda   :  { %1145 = vmatprep.subr.bf16.mxu0 %v2057_v50  ;;  %1273 = vmatprep.subr.bf16.mxu1 %v2059_v39  ;;  %v2081_v31 = vpack.c.bf16 %v283_v63, %v279_v48  ;;  %v2083_v58 = vpack.c.bf16 %v285_v13, %v281_v46  ;;  %v287_v39 = vld [vmem:[#allocation6 + $0x708] sm:$0xff]  ;;  %v289_v50 = vld [vmem:[#allocation6 + $0x718] sm:$0xff]  ;;  %2463 = vst [vmem:[#allocation88_spill] sm:$0xff] %v2089_v40  ;;  %v288_v63 = vld [vmem:[#allocation6 + $0x710] sm:$0xff] }
  0xdb   :  { %v292_v13 = vld [vmem:[#allocation6 + $0x730] sm:$0xff]  ;;  %v2111_v28 = vpack.c.bf16 %v298_v0, %v294_v29 }
  0xdc   :  { %2460 = vst [vmem:[#allocation85_spill] sm:$0xff] %v2081_v31  ;;  %2461 = vst [vmem:[#allocation86_spill] sm:$0xff] %v2083_v58  ;;  %v2101_v62 = vpack.c.bf16 %v292_v13, %v288_v63  ;;  %v302_v63 = vld [vmem:[#allocation6 + $0x780] sm:$0xff] }
  0xdd   :  { %1147 = vmatpush1.bf16.msra.mxu0 %v2063_v45  ;;  %1275 = vmatpush1.bf16.msra.mxu1 %v2065_v24  ;;  %v291_v45 = vld [vmem:[#allocation6 + $0x728] sm:$0xff]  ;;  %v293_v24 = vld [vmem:[#allocation6 + $0x738] sm:$0xff]  ;;  %v306_v13 = vld [vmem:[#allocation6 + $0x7a0] sm:$0xff] }
  0xde   :  { %1149 = vmatprep.subr.bf16.mxu0 %v2069_v23  ;;  %1277 = vmatprep.subr.bf16.mxu1 %v2071_v4  ;;  %v2093_v46 = vpack.c.bf16 %v291_v45, %v287_v39  ;;  %v2095_v48 = vpack.c.bf16 %v293_v24, %v289_v50  ;;  %v295_v4 = vld [vmem:[#allocation6 + $0x748] sm:$0xff]  ;;  %v297_v23 = vld [vmem:[#allocation6 + $0x758] sm:$0xff]  ;;  %2467 = vst [vmem:[#allocation92_spill] sm:$0xff] %v2101_v62  ;;  %v296_v45 = vld [vmem:[#allocation6 + $0x750] sm:$0xff] }
  0xdf   :  { %v300_v24 = vld [vmem:[#allocation6 + $0x770] sm:$0xff]  ;;  %v2124_v29 = vpack.c.bf16 %v306_v13, %v302_v63 }
  0xe0   :  { %2464 = vst [vmem:[#allocation89_spill] sm:$0xff] %v2093_v46  ;;  %2465 = vst [vmem:[#allocation90_spill] sm:$0xff] %v2095_v48  ;;  %v2113_v5 = vpack.c.bf16 %v300_v24, %v296_v45  ;;  %v316_v45 = vld [vmem:[#allocation6 + $0x7f0] sm:$0xff] }
  0xe1   :  { %1151 = vmatpush1.bf16.msra.mxu0 %v2075_v14  ;;  %1279 = vmatpush1.bf16.msra.mxu1 %v2077_v33  ;;  %v299_v14 = vld [vmem:[#allocation6 + $0x768] sm:$0xff]  ;;  %v301_v33 = vld [vmem:[#allocation6 + $0x778] sm:$0xff]  ;;  %v2509_v13 = vld [vmem:[#allocation56_spill] sm:$0xff] }
  0xe2   :  { %1153 = vmatprep.subr.bf16.mxu0 %v2081_v31  ;;  %1281 = vmatprep.subr.bf16.mxu1 %v2083_v58  ;;  %v2105_v50 = vpack.c.bf16 %v299_v14, %v295_v4  ;;  %v2107_v39 = vpack.c.bf16 %v301_v33, %v297_v23  ;;  %v303_v58 = vld [vmem:[#allocation6 + $0x788] sm:$0xff]  ;;  %v305_v31 = vld [vmem:[#allocation6 + $0x798] sm:$0xff]  ;;  %v304_v14 = vld [vmem:[#allocation6 + $0x790] sm:$0xff] }
  0xe3   :  { %v308_v33 = vld [vmem:[#allocation6 + $0x7b0] sm:$0xff] }
  0xe4   :  { %v2126_v0 = vpack.c.bf16 %v308_v33, %v304_v14  ;;  %v2510_v14 = vld [vmem:[#allocation57_spill] sm:$0xff]  ;;  %v2511_v33 = vld [vmem:[#allocation58_spill] sm:$0xff] }
  0xe5   :  { %1155 = vmatpush1.bf16.msra.mxu0 %v2087_v15  ;;  %1283 = vmatpush1.bf16.msra.mxu1 %v2089_v40  ;;  %v307_v15 = vld [vmem:[#allocation6 + $0x7a8] sm:$0xff]  ;;  %v309_v40 = vld [vmem:[#allocation6 + $0x7b8] sm:$0xff] }
  0xe6   :  { %1157 = vmatprep.subr.bf16.mxu0 %v2093_v46  ;;  %1285 = vmatprep.subr.bf16.mxu1 %v2095_v48  ;;  %v2117_v23 = vpack.c.bf16 %v307_v15, %v303_v58  ;;  %v2119_v4 = vpack.c.bf16 %v309_v40, %v305_v31  ;;  %v311_v48 = vld [vmem:[#allocation6 + $0x7c8] sm:$0xff]  ;;  %v313_v46 = vld [vmem:[#allocation6 + $0x7d8] sm:$0xff]  ;;  %v310_v58 = vld [vmem:[#allocation6 + $0x7c0] sm:$0xff] }
  0xe7   :  { %v312_v40 = vld [vmem:[#allocation6 + $0x7d0] sm:$0xff]  ;;  %v2137_v24 = vpack.c.bf16 %v314_v60, %v310_v58  ;;  %v2512_v58 = vld [vmem:[#allocation59_spill] sm:$0xff] }
  0xe8   :  { %v2139_v63 = vpack.c.bf16 %v316_v45, %v312_v40  ;;  %v2513_v60 = vld [vmem:[#allocation60_spill] sm:$0xff]  ;;  %v2514_v40 = vld [vmem:[#allocation61_spill] sm:$0xff]  ;;  %v2515_v45 = vld [vmem:[#allocation62_spill] sm:$0xff] }
  0xe9   :  { %1159 = vmatpush1.bf16.msra.mxu0 %v2099_v49  ;;  %1287 = vmatpush1.bf16.msra.mxu1 %v2101_v62  ;;  %v315_v49 = vld [vmem:[#allocation6 + $0x7e8] sm:$0xff]  ;;  %v317_v62 = vld [vmem:[#allocation6 + $0x7f8] sm:$0xff] }
  0xea   :  { %1161 = vmatprep.subr.bf16.mxu0 %v2105_v50  ;;  %1289 = vmatprep.subr.bf16.mxu1 %v2107_v39  ;;  %v2131_v31 = vpack.c.bf16 %v315_v49, %v311_v48  ;;  %v2133_v15 = vpack.c.bf16 %v317_v62, %v313_v46  ;;  %v1587_v46 = vpop.eup %1586  ;;  %v2506_v48 = vld [vmem:[#allocation53_spill] sm:$0xff]  ;;  %v2507_v49 = vld [vmem:[#allocation54_spill] sm:$0xff]  ;;  %v2508_v62 = vld [vmem:[#allocation55_spill] sm:$0xff] }
  0xed   :  { %1163 = vmatpush1.bf16.msra.mxu0 %v2111_v28  ;;  %1291 = vmatpush1.bf16.msra.mxu1 %v2113_v5 }
  0xee   :  { %1165 = vmatprep.subr.bf16.mxu0 %v2117_v23  ;;  %1293 = vmatprep.subr.bf16.mxu1 %v2119_v4 }
  0xf1   :  { %1167 = vmatpush1.bf16.msra.mxu0 %v2124_v29  ;;  %1295 = vmatpush1.bf16.msra.mxu1 %v2126_v0 }
  0xf2   :  { %1169 = vmatprep.subr.bf16.mxu0 %v2131_v31  ;;  %1297 = vmatprep.subr.bf16.mxu1 %v2133_v15 }
  0xf5   :  { %1171 = vmatpush1.bf16.msra.mxu0 %v2137_v24  ;;  %1299 = vmatpush1.bf16.msra.mxu1 %v2139_v63 }
  0xf6   :  { %1301 = vmatprep.subr.bf16.mxu0 %v1730_v7  ;;  %1429 = vmatprep.subr.bf16.mxu1 %v1732_v8  ;;  %v2468_v7 = vld [vmem:[#allocation10_spill] sm:$0xff]  ;;  %v2469_v8 = vld [vmem:[#allocation11_spill] sm:$0xff] }
  0xf8   :  { %535 = vmatmul.mubr.f32.vlgmr.msra.gmra.mrb[0].mxu0 %v1585_v32  ;;  %677 = vmatmul.mubr.f32.vlgmr.msra.gmra.mrb[0].mxu1 %v1585_v32  ;;  %v2516_v32 = vld [vmem:[#allocation63_spill] sm:$0xff] }
  0xf9   :  { %1303 = vmatpush1.bf16.msra.mxu0 %v1734_v12  ;;  %803 = vmatprep.mubr.f32.mxu0 %v1587_v46  ;;  %v2470_v12 = vld [vmem:[#allocation12_spill] sm:$0xff] }
  0xfa   :  { %1431 = vmatpush1.bf16.msra.mxu1 %v1738_v16  ;;  %945 = vmatprep.mubr.f32.mxu1 %v1587_v46  ;;  %v2471_v16 = vld [vmem:[#allocation13_spill] sm:$0xff]  ;;  %v2517_v46 = vld [vmem:[#allocation64_spill] sm:$0xff] }
  0xfb   :  { %1305 = vmatprep.subr.bf16.mxu0 %v1740_v17  ;;  %1433 = vmatprep.subr.bf16.mxu1 %v1743_v21  ;;  %v2472_v17 = vld [vmem:[#allocation14_spill] sm:$0xff]  ;;  %v2473_v21 = vld [vmem:[#allocation15_spill] sm:$0xff] }
  0xfd   :  { %1307 = vmatpush1.bf16.msra.mxu0 %v1747_v25  ;;  %v2474_v25 = vld [vmem:[#allocation16_spill] sm:$0xff] }
  0xfe   :  { %1435 = vmatpush1.bf16.msra.mxu1 %v1749_v26  ;;  %1309 = vmatprep.subr.bf16.mxu0 %v1752_v30  ;;  %v2475_v26 = vld [vmem:[#allocation17_spill] sm:$0xff]  ;;  %v2476_v30 = vld [vmem:[#allocation18_spill] sm:$0xff] }
  0xff   :  { %1437 = vmatprep.subr.bf16.mxu1 %v1754_v34  ;;  %v2477_v34 = vld [vmem:[#allocation19_spill] sm:$0xff] }
 0x101   :  { %1311 = vmatpush1.bf16.msra.mxu0 %v1757_v38  ;;  %v2478_v38 = vld [vmem:[#allocation20_spill] sm:$0xff] }
 0x102   :  { %1439 = vmatpush1.bf16.msra.mxu1 %v1761_v42  ;;  %1313 = vmatprep.subr.bf16.mxu0 %v1763_v43  ;;  %v2479_v42 = vld [vmem:[#allocation21_spill] sm:$0xff]  ;;  %v2480_v43 = vld [vmem:[#allocation22_spill] sm:$0xff] }
 0x103   :  { %1441 = vmatprep.subr.bf16.mxu1 %v1766_v47  ;;  %v2481_v47 = vld [vmem:[#allocation23_spill] sm:$0xff] }
 0x105   :  { %1315 = vmatpush1.bf16.msra.mxu0 %v1769_v53  ;;  %v2482_v53 = vld [vmem:[#allocation24_spill] sm:$0xff] }
 0x106   :  { %1443 = vmatpush1.bf16.msra.mxu1 %v1773_v54  ;;  %1317 = vmatprep.subr.bf16.mxu0 %v1775_v55  ;;  %v2483_v54 = vld [vmem:[#allocation25_spill] sm:$0xff]  ;;  %v2484_v55 = vld [vmem:[#allocation26_spill] sm:$0xff] }
 0x107   :  { %1445 = vmatprep.subr.bf16.mxu1 %v1778_v59  ;;  %v2485_v59 = vld [vmem:[#allocation27_spill] sm:$0xff] }
 0x109   :  { %1319 = vmatpush1.bf16.msra.mxu0 %v1781_v1  ;;  %v2486_v1 = vld [vmem:[#allocation28_spill] sm:$0xff] }
 0x10a   :  { %1447 = vmatpush1.bf16.msra.mxu1 %v1785_v2  ;;  %1321 = vmatprep.subr.bf16.mxu0 %v1787_v3  ;;  %v2487_v2 = vld [vmem:[#allocation29_spill] sm:$0xff]  ;;  %v2488_v3 = vld [vmem:[#allocation30_spill] sm:$0xff] }
 0x10b   :  { %1449 = vmatprep.subr.bf16.mxu1 %v1790_v9  ;;  %v2489_v9 = vld [vmem:[#allocation31_spill] sm:$0xff] }
 0x10d   :  { %1323 = vmatpush1.bf16.msra.mxu0 %v1793_v18  ;;  %v2490_v18 = vld [vmem:[#allocation32_spill] sm:$0xff] }
 0x10e   :  { %1451 = vmatpush1.bf16.msra.mxu1 %v1797_v19  ;;  %1325 = vmatprep.subr.bf16.mxu0 %v1799_v20  ;;  %v2491_v19 = vld [vmem:[#allocation33_spill] sm:$0xff]  ;;  %v2492_v20 = vld [vmem:[#allocation34_spill] sm:$0xff] }
 0x10f   :  { %1453 = vmatprep.subr.bf16.mxu1 %v1802_v27  ;;  %v2493_v27 = vld [vmem:[#allocation35_spill] sm:$0xff] }
 0x111   :  { %1327 = vmatpush1.bf16.msra.mxu0 %v1805_v35  ;;  %v2494_v35 = vld [vmem:[#allocation36_spill] sm:$0xff] }
 0x112   :  { %1455 = vmatpush1.bf16.msra.mxu1 %v1809_v36  ;;  %1329 = vmatprep.subr.bf16.mxu0 %v1811_v37  ;;  %v1589_v36 = vpop.eup %1588  ;;  %v2495_v37 = vld [vmem:[#allocation37_spill] sm:$0xff] }
 0x113   :  { %1457 = vmatprep.subr.bf16.mxu1 %v1814_v44  ;;  %v1591_v44 = vpop.eup %1590 }
 0x115   :  { %1331 = vmatpush1.bf16.msra.mxu0 %v1817_v51  ;;  %v2496_v51 = vld [vmem:[#allocation43_spill] sm:$0xff] }
 0x116   :  { %1459 = vmatpush1.bf16.msra.mxu1 %v1821_v52  ;;  %1333 = vmatprep.subr.bf16.mxu0 %v1823_v56  ;;  %v2497_v52 = vld [vmem:[#allocation44_spill] sm:$0xff]  ;;  %v2498_v56 = vld [vmem:[#allocation45_spill] sm:$0xff] }
 0x117   :  { %1461 = vmatprep.subr.bf16.mxu1 %v1826_v61  ;;  %v2499_v61 = vld [vmem:[#allocation46_spill] sm:$0xff] }
 0x119   :  { %1335 = vmatpush1.bf16.msra.mxu0 %v1829_v6  ;;  %v2500_v6 = vld [vmem:[#allocation47_spill] sm:$0xff] }
 0x11a   :  { %1463 = vmatpush1.bf16.msra.mxu1 %v1833_v10  ;;  %1337 = vmatprep.subr.bf16.mxu0 %v1835_v11  ;;  %v2501_v10 = vld [vmem:[#allocation48_spill] sm:$0xff]  ;;  %v2502_v11 = vld [vmem:[#allocation49_spill] sm:$0xff] }
 0x11b   :  { %1465 = vmatprep.subr.bf16.mxu1 %v1838_v22  ;;  %v2503_v22 = vld [vmem:[#allocation50_spill] sm:$0xff] }
 0x11d   :  { %1339 = vmatpush1.bf16.msra.mxu0 %v2468_v7  ;;  %v2518_v7 = vld [vmem:[#allocation65_spill] sm:$0xff] }
 0x11e   :  { %1467 = vmatpush1.bf16.msra.mxu1 %v2469_v8  ;;  %1341 = vmatprep.subr.bf16.mxu0 %v2470_v12  ;;  %v2519_v8 = vld [vmem:[#allocation66_spill] sm:$0xff]  ;;  %v2520_v12 = vld [vmem:[#allocation67_spill] sm:$0xff] }
 0x11f   :  { %1469 = vmatprep.subr.bf16.mxu1 %v2471_v16  ;;  %v2521_v16 = vld [vmem:[#allocation68_spill] sm:$0xff] }
 0x121   :  { %1343 = vmatpush1.bf16.msra.mxu0 %v2472_v17  ;;  %v2522_v17 = vld [vmem:[#allocation69_spill] sm:$0xff] }
 0x122   :  { %1471 = vmatpush1.bf16.msra.mxu1 %v2473_v21  ;;  %1345 = vmatprep.subr.bf16.mxu0 %v2474_v25  ;;  %v2523_v21 = vld [vmem:[#allocation70_spill] sm:$0xff]  ;;  %v2524_v25 = vld [vmem:[#allocation71_spill] sm:$0xff] }
 0x123   :  { %1473 = vmatprep.subr.bf16.mxu1 %v2475_v26  ;;  %v2525_v26 = vld [vmem:[#allocation72_spill] sm:$0xff] }
 0x125   :  { %1347 = vmatpush1.bf16.msra.mxu0 %v2476_v30  ;;  %v2526_v30 = vld [vmem:[#allocation73_spill] sm:$0xff] }
 0x126   :  { %1475 = vmatpush1.bf16.msra.mxu1 %v2477_v34  ;;  %1349 = vmatprep.subr.bf16.mxu0 %v2478_v38  ;;  %v2527_v34 = vld [vmem:[#allocation74_spill] sm:$0xff]  ;;  %v2528_v38 = vld [vmem:[#allocation75_spill] sm:$0xff] }
 0x127   :  { %1477 = vmatprep.subr.bf16.mxu1 %v2479_v42  ;;  %v2529_v42 = vld [vmem:[#allocation76_spill] sm:$0xff] }
 0x129   :  { %1351 = vmatpush1.bf16.msra.mxu0 %v2480_v43  ;;  %v2530_v43 = vld [vmem:[#allocation77_spill] sm:$0xff] }
 0x12a   :  { %1479 = vmatpush1.bf16.msra.mxu1 %v2481_v47  ;;  %1353 = vmatprep.subr.bf16.mxu0 %v2482_v53  ;;  %v2531_v47 = vld [vmem:[#allocation78_spill] sm:$0xff]  ;;  %v2532_v53 = vld [vmem:[#allocation79_spill] sm:$0xff] }
 0x12b   :  { %1481 = vmatprep.subr.bf16.mxu1 %v2483_v54  ;;  %v2533_v54 = vld [vmem:[#allocation80_spill] sm:$0xff] }
 0x12d   :  { %1355 = vmatpush1.bf16.msra.mxu0 %v2484_v55  ;;  %v2534_v55 = vld [vmem:[#allocation81_spill] sm:$0xff] }
 0x12e   :  { %1483 = vmatpush1.bf16.msra.mxu1 %v2485_v59  ;;  %1357 = vmatprep.subr.bf16.mxu0 %v2486_v1  ;;  %v2535_v59 = vld [vmem:[#allocation82_spill] sm:$0xff]  ;;  %v2536_v1 = vld [vmem:[#allocation83_spill] sm:$0xff] }
 0x12f   :  { %1485 = vmatprep.subr.bf16.mxu1 %v2487_v2  ;;  %v2537_v2 = vld [vmem:[#allocation84_spill] sm:$0xff] }
 0x131   :  { %1359 = vmatpush1.bf16.msra.mxu0 %v2488_v3  ;;  %v2538_v3 = vld [vmem:[#allocation85_spill] sm:$0xff] }
 0x132   :  { %1487 = vmatpush1.bf16.msra.mxu1 %v2489_v9  ;;  %1361 = vmatprep.subr.bf16.mxu0 %v2490_v18  ;;  %v2539_v9 = vld [vmem:[#allocation86_spill] sm:$0xff]  ;;  %v2540_v18 = vld [vmem:[#allocation87_spill] sm:$0xff] }
 0x133   :  { %1489 = vmatprep.subr.bf16.mxu1 %v2491_v19  ;;  %v2541_v19 = vld [vmem:[#allocation88_spill] sm:$0xff] }
 0x135   :  { %1363 = vmatpush1.bf16.msra.mxu0 %v2492_v20  ;;  %v2542_v20 = vld [vmem:[#allocation89_spill] sm:$0xff] }
 0x136   :  { %1491 = vmatpush1.bf16.msra.mxu1 %v2493_v27  ;;  %1365 = vmatprep.subr.bf16.mxu0 %v2494_v35  ;;  %v2543_v27 = vld [vmem:[#allocation90_spill] sm:$0xff]  ;;  %v2544_v35 = vld [vmem:[#allocation91_spill] sm:$0xff] }
 0x137   :  { %1493 = vmatprep.subr.bf16.mxu1 %v2495_v37  ;;  %v2546_v37 = vld [vmem:[#allocation42_spill] sm:$0xff] }
 0x138   :  { %804 = vmatmul.mubr.f32.vlgmr.msra.gmra.mrb[2].mxu0 %v1589_v36  ;;  %1592 = vtanh.f32 %v2546_v37 }
 0x139   :  { %946 = vmatmul.mubr.f32.vlgmr.msra.gmra.mrb[2].mxu1 %v1589_v36  ;;  %1367 = vmatpush1.bf16.msra.mxu0 %v2496_v51  ;;  %v2545_v36 = vld [vmem:[#allocation92_spill] sm:$0xff]  ;;  %v2550_v51 = vld [vmem:[#allocation41_spill] sm:$0xff] }
 0x13a   :  { %874 = vmatprep.mubr.f32.mxu0 %v1591_v44  ;;  %1495 = vmatpush1.bf16.msra.mxu1 %v2497_v52 }
 0x13b   :  { %1016 = vmatprep.mubr.f32.mxu1 %v1591_v44  ;;  %1369 = vmatprep.subr.bf16.mxu0 %v2498_v56  ;;  %v2549_v44 = vld [vmem:[#allocation39_spill] sm:$0xff] }
 0x13c   :  { %1497 = vmatprep.subr.bf16.mxu1 %v2499_v61 }
 0x13d   :  { %1371 = vmatpush1.bf16.msra.mxu0 %v2500_v6 }
 0x13e   :  { %1499 = vmatpush1.bf16.msra.mxu1 %v2501_v10  ;;  %1373 = vmatprep.subr.bf16.mxu0 %v2502_v11  ;;  %v55_v10 = vld [vmem:[#allocation4 + $0x4] ss:$8 sm:$0xf] }
 0x13f   :  { %1501 = vmatprep.subr.bf16.mxu1 %v2503_v22  ;;  %v695_v22 = vrot.slane %v55_v10, %v2549_v44 }
 0x141   :  { %1375 = vmatpush1.bf16.msra.mxu0 %v2504_v41 }
 0x142   :  { %1503 = vmatpush1.bf16.msra.mxu1 %v2505_v57  ;;  %1377 = vmatprep.subr.bf16.mxu0 %v2506_v48 }
 0x143   :  { %1505 = vmatprep.subr.bf16.mxu1 %v2507_v49 }
 0x145   :  { %1379 = vmatpush1.bf16.msra.mxu0 %v2508_v62 }
 0x146   :  { %1507 = vmatpush1.bf16.msra.mxu1 %v2509_v13  ;;  %1381 = vmatprep.subr.bf16.mxu0 %v2510_v14  ;;  %v703_v13 = vrot.slane %v55_v10, %v2550_v51 }
 0x147   :  { %1509 = vmatprep.subr.bf16.mxu1 %v2511_v33 }
 0x149   :  { %1383 = vmatpush1.bf16.msra.mxu0 %v2512_v58 }
 0x14a   :  { %1511 = vmatpush1.bf16.msra.mxu1 %v2513_v60  ;;  %1385 = vmatprep.subr.bf16.mxu0 %v2514_v40 }
 0x14b   :  { %1513 = vmatprep.subr.bf16.mxu1 %v2515_v45 }
 0x14d   :  { %1387 = vmatpush1.bf16.msra.mxu0 %v2516_v32 }
 0x14e   :  { %1515 = vmatpush1.bf16.msra.mxu1 %v2517_v46  ;;  %1389 = vmatprep.subr.bf16.mxu0 %v2518_v7 }
 0x14f   :  { %1517 = vmatprep.subr.bf16.mxu1 %v2519_v8 }
 0x151   :  { %1391 = vmatpush1.bf16.msra.mxu0 %v2520_v12 }
 0x152   :  { %1519 = vmatpush1.bf16.msra.mxu1 %v2521_v16  ;;  %1393 = vmatprep.subr.bf16.mxu0 %v2522_v17 }
 0x153   :  { %1521 = vmatprep.subr.bf16.mxu1 %v2523_v21 }
 0x155   :  { %1395 = vmatpush1.bf16.msra.mxu0 %v2524_v25 }
 0x156   :  { %1523 = vmatpush1.bf16.msra.mxu1 %v2525_v26  ;;  %1397 = vmatprep.subr.bf16.mxu0 %v2526_v30 }
 0x157   :  { %1525 = vmatprep.subr.bf16.mxu1 %v2527_v34 }
 0x159   :  { %1399 = vmatpush1.bf16.msra.mxu0 %v2528_v38 }
 0x15a   :  { %1527 = vmatpush1.bf16.msra.mxu1 %v2529_v42  ;;  %1401 = vmatprep.subr.bf16.mxu0 %v2530_v43 }
 0x15b   :  { %1529 = vmatprep.subr.bf16.mxu1 %v2531_v47 }
 0x15d   :  { %1403 = vmatpush1.bf16.msra.mxu0 %v2532_v53 }
 0x15e   :  { %1531 = vmatpush1.bf16.msra.mxu1 %v2533_v54  ;;  %1405 = vmatprep.subr.bf16.mxu0 %v2534_v55 }
 0x15f   :  { %1533 = vmatprep.subr.bf16.mxu1 %v2535_v59 }
 0x161   :  { %1407 = vmatpush1.bf16.msra.mxu0 %v2536_v1  ;;  %v717_v1 = vstv %s2294_s1 }
 0x162   :  { %1535 = vmatpush1.bf16.msra.mxu1 %v2537_v2  ;;  %1409 = vmatprep.subr.bf16.mxu0 %v2538_v3 }
 0x163   :  { %1537 = vmatprep.subr.bf16.mxu1 %v2539_v9 }
 0x165   :  { %1411 = vmatpush1.bf16.msra.mxu0 %v2540_v18 }
 0x166   :  { %1539 = vmatpush1.bf16.msra.mxu1 %v2541_v19  ;;  %1413 = vmatprep.subr.bf16.mxu0 %v2542_v20 }
 0x167   :  { %1541 = vmatprep.subr.bf16.mxu1 %v2543_v27 }
 0x169   :  { %1415 = vmatpush1.bf16.msra.mxu0 %v2544_v35 }
 0x16a   :  { %1543 = vmatpush1.bf16.msra.mxu1 %v2545_v36  ;;  %1417 = vmatprep.subr.bf16.mxu0 %v2105_v50  ;;  %v1593_v50 = vpop.eup %1592 }
 0x16b   :  { %1545 = vmatprep.subr.bf16.mxu1 %v2107_v39  ;;  %v53_v39 = vld [vmem:[#allocation4 + $0x3] ss:$8 sm:$0xf] }
 0x16d   :  { %1419 = vmatpush1.bf16.msra.mxu0 %v2111_v28  ;;  %v2547_v28 = vld [vmem:[#allocation38_spill] sm:$0xff] }
 0x16e   :  { %1547 = vmatpush1.bf16.msra.mxu1 %v2113_v5  ;;  %1421 = vmatprep.subr.bf16.mxu0 %v2117_v23  ;;  %v382_v5 = vrot.slane %v53_v39, %v2547_v28  ;;  %v2548_v23 = vld [vmem:[#allocation40_spill] sm:$0xff]  ;;  %v691_v11 = vrot.slane %v55_v10, %v2547_v28 }
 0x16f   :  { %1549 = vmatprep.subr.bf16.mxu1 %v2119_v4  ;;  %v390_v4 = vrot.slane %v53_v39, %v2548_v23  ;;  %v699_v48 = vrot.slane %v55_v10, %v2548_v23 }
 0x171   :  { %1423 = vmatpush1.bf16.msra.mxu0 %v2124_v29  ;;  %v386_v29 = vrot.slane %v53_v39, %v2549_v44 }
 0x172   :  { %1551 = vmatpush1.bf16.msra.mxu1 %v2126_v0  ;;  %1425 = vmatprep.subr.bf16.mxu0 %v2131_v31  ;;  %v394_v0 = vrot.slane %v53_v39, %v2550_v51 }
 0x173   :  { %1553 = vmatprep.subr.bf16.mxu1 %v2133_v15 }
 0x175   :  { %1427 = vmatpush1.bf16.msra.mxu0 %v2137_v24 }
 0x176   :  { %1555 = vmatpush1.bf16.msra.mxu1 %v2139_v63 }
 0x178   :  { %875 = vmatmul.mubr.f32.vlgmr.msra.gmra.mrb[2].mxu0 %v1593_v50 }
 0x179   :  { %1017 = vmatmul.mubr.f32.vlgmr.msra.gmra.mrb[2].mxu1 %v1593_v50 }
 0x1cb   :  { %v536_v52 = vpop.f32.mrb[0].mxu0  ;;  %v678_v31 = vpop.f32.mrb[0].mxu1 }
 0x1cc   :  { %v1556_v56 = vadd.f32 %v536_v52, %v382_v5  ;;  %v1558_v15 = vadd.f32 %v678_v31, %v390_v4  ;;  %v538_v61 = vpop.f32.mrb[1].mxu0  ;;  %v680_v24 = vpop.f32.mrb[1].mxu1 }
 0x1cd   :  { %v1557_v6 = vadd.f32 %v538_v61, %v386_v29  ;;  %v1559_v63 = vadd.f32 %v680_v24, %v394_v0 }
 0x1ce   :  { %1594 = vtanh.f32 %v1556_v56 }
 0x1cf   :  { %1596 = vtanh.f32 %v1558_v15 }
 0x1d0   :  { %1598 = vtanh.f32 %v1557_v6 }
 0x1d1   :  { %1600 = vtanh.f32 %v1559_v63 }
 0x1d8   :  { %v1595_v41 = vpop.eup %1594 }
 0x1d9   :  { %v1597_v57 = vpop.eup %1596  ;;  %v708_v49 = vmul.f32 %v1595_v41, %v691_v11 }
 0x1da   :  { %v1599_v62 = vpop.eup %1598  ;;  %v710_v58 = vmul.f32 %v1597_v57, %v699_v48 }
 0x1db   :  { %v709_v14 = vmul.f32 %v1599_v62, %v695_v22  ;;  %v1601_v33 = vpop.eup %1600 }
 0x1dc   :  { %v711_v40 = vmul.f32 %v1601_v33, %v703_v13 }
 0x1dd   :  { %v712_v60 = vadd.f32 %v709_v14, %v708_v49 }
 0x1df   :  { %v713_v45 = vadd.f32 %v712_v60, %v710_v58 }
 0x1e1   :  { %v714_v32 = vadd.f32 %v713_v45, %v711_v40 }
 0x1e3   :  { %715 = vadd.xlane.f32.xlu1 %v714_v32 }
 0x24b   :  { %v876_v46 = vpop.f32.mrb[2].mxu0 }
 0x24c   :  { %v1560_v7 = vadd.f32 %v876_v46, %v382_v5  ;;  %v1018_v8 = vpop.f32.mrb[2].mxu1  ;;  %v878_v12 = vpop.f32.mrb[3].mxu0 }
 0x24d   :  { %v1562_v16 = vadd.f32 %v1018_v8, %v390_v4  ;;  %v1561_v17 = vadd.f32 %v878_v12, %v386_v29  ;;  %v1020_v21 = vpop.f32.mrb[3].mxu1 }
 0x24e   :  { %1602 = vtanh.f32 %v1560_v7  ;;  %v1563_v25 = vadd.f32 %v1020_v21, %v394_v0 }
 0x24f   :  { %1604 = vtanh.f32 %v1562_v16 }
 0x250   :  { %1606 = vtanh.f32 %v1561_v17 }
 0x251   :  { %1608 = vtanh.f32 %v1563_v25 }
 0x258   :  { %v1603_v26 = vpop.eup %1602 }
 0x259   :  { %v1605_v30 = vpop.eup %1604  ;;  %v1027_v34 = vmul.f32 %v1603_v26, %v691_v11 }
 0x25a   :  { %v1607_v38 = vpop.eup %1606  ;;  %v1029_v47 = vmul.f32 %v1605_v30, %v699_v48 }
 0x25b   :  { %v1028_v42 = vmul.f32 %v1607_v38, %v695_v22  ;;  %v1609_v43 = vpop.eup %1608 }
 0x25c   :  { %v1030_v54 = vmul.f32 %v1609_v43, %v703_v13 }
 0x25d   :  { %v1031_v53 = vadd.f32 %v1028_v42, %v1027_v34 }
 0x25f   :  { %v1032_v55 = vadd.f32 %v1031_v53, %v1029_v47 }
 0x261   :  { %v1033_v59 = vadd.f32 %v1032_v55, %v1030_v54 }
 0x263   :  { %1034 = vadd.xlane.f32.xlu1 %v1033_v59 }
 0x270   :  { %v716_v2 = vpop.xlane.xlu1 %715 }
 0x271   :  { %v718_v3 = vadd.f32 %v717_v1, %v716_v2 }
 0x273   :  { %720 = vst.msk [vmem:[%s2298_s5] sm:$0xff] %vm719_vm0, %v718_v3 }
 0x2f0   :  { %v1035_v9 = vpop.xlane.xlu1 %1034 }
 0x2f1   :  { %v1036_v18 = vadd.f32 %v1035_v9, %v717_v1 }
 0x2f3   :  { %1037 = vst.msk [vmem:[%s2298_s5 + $0x8] sm:$0xff] %vm719_vm0, %v1036_v18 }
 0x2f4   :  { %1042 = vsyncpa [#allocation5], 1 }
 0x2f5   :  { %1043 = vsyncpa [#allocation7], 1 }

</bundles_post_ra>
